<compile_context>
chip_gen: v6e
topology: v6e:2x2x1
jax: 0.10.0
libtpu: 0.0.40
codegen_flags: <defaults>
</compile_context>

<pallas_src>
import functools

import jax
import jax.numpy as jnp
from jax.experimental import pallas as pl
from jax.experimental.pallas import tpu as pltpu

_LANE = 128                     # TPU lane width: output channels padded to this
_MAX_TILE_M = 512               # row-tile upper bound for the 1x1-conv matmuls
_VMEM_LIMIT = 32 * 1024 * 1024  # raise v5e's 16 MiB default; <= v7x physical


def _round_up(x, m):
    return (x + m - 1) // m * m


# ----------------------------- Pallas kernels ------------------------------

def _mm_bn_act_kernel(x_ref, w_ref, scale_ref, bias_ref, o_ref, *, relu):
    """out = relu?((x @ w) * scale + bias)   — 1x1 conv + folded BN (+ ReLU)."""
    acc = jnp.dot(x_ref[...], w_ref[...], preferred_element_type=jnp.float32)
    y = acc * scale_ref[...] + bias_ref[...]
    if relu:
        y = jnp.maximum(y, 0.0)
    o_ref[...] = y.astype(o_ref.dtype)


def _mm_bn_res_add_relu_kernel(x_ref, w_ref, scale_ref, bias_ref, res_ref, o_ref):
    """out = relu((x @ w) * scale + bias + residual) — conv3+bn3+identity skip."""
    acc = jnp.dot(x_ref[...], w_ref[...], preferred_element_type=jnp.float32)
    y = acc * scale_ref[...] + bias_ref[...] + res_ref[...].astype(jnp.float32)
    o_ref[...] = jnp.maximum(y, 0.0).astype(o_ref.dtype)


def _mm_bn_proj_add_relu_kernel(x_ref, w_ref, scale_ref, bias_ref,
                                xs_ref, wsc_ref, ssc_ref, bsc_ref, o_ref):
    """out = relu(bn3(x @ w3) + bnsc(xs @ wsc)) — conv3 + fused projection skip."""
    main = jnp.dot(x_ref[...], w_ref[...], preferred_element_type=jnp.float32)
    main = main * scale_ref[...] + bias_ref[...]
    sc = jnp.dot(xs_ref[...], wsc_ref[...], preferred_element_type=jnp.float32)
    sc = sc * ssc_ref[...] + bsc_ref[...]
    o_ref[...] = jnp.maximum(main + sc, 0.0).astype(o_ref.dtype)


def _conv3x3_s1_kernel(x_ref, w_ref, scale_ref, bias_ref, o_ref, pad_ref, *, wp_al):
    """3x3 conv (pad=1, stride=1) + folded BN + ReLU for one output row-tile.

    x_ref:   (H, W, Cin_p)  full image, resident across the row-tile axis.
    w_ref:   (9, Cin_p, Cout_p) tap-major (dy*3+dx).
    o_ref:   (rt, W, Cout_p) dense output row-tile (cropped in-kernel).
    pad_ref: ((rt+3)*wp_al, Cin_p) VMEM scratch: zero-padded rows
             [r0 .. r0+rt+2) of the padded image, flattened row-major.
    Padding, im2col (shifted flat windows) and cropping all stay in VMEM.
    """
    H, W, _ = x_ref.shape
    rt, _, cout = o_ref.shape
    r0 = pl.program_id(1) * rt

    # In-kernel zero padding straight from the NHWC block.
    pad_ref[...] = jnp.zeros_like(pad_ref)
    for m in range(rt + 2):                       # padded rows needed by this tile
        hx = r0 + (m - 1)                          # source image row

        @pl.when((hx >= 0) & (hx < H))
        def _copy():
            pad_ref[pl.ds(m * wp_al + 1, W), :] = x_ref[hx, :, :]

    # 9 accumulating MXU matmuls over shifted flat windows (in-VMEM im2col).
    acc = jnp.zeros((rt * wp_al, cout), jnp.float32)
    for dy in range(3):
        for dx in range(3):
            lhs = pad_ref[pl.ds(dy * wp_al + dx, rt * wp_al), :]
            acc = acc + jnp.dot(lhs, w_ref[dy * 3 + dx],
                                preferred_element_type=jnp.float32)

    y = jnp.maximum(acc * scale_ref[...] + bias_ref[...], 0.0)
    # In-kernel crop of the wp_al-wide rows to the dense W-wide output.
    o_ref[...] = y.reshape(rt, wp_al, cout)[:, :W, :].astype(o_ref.dtype)


def _conv3x3_phase_kernel(xph_ref, w_ref, scale_ref, bias_ref, o_ref, *,
                          stride, wph_al):
    """Strided 3x3 conv (pad=1) + folded BN + ReLU for one image.

    xph_ref: (s*s, Lp, Cin_p) phase-decomposed, spatially padded, flattened
             activation (phase (p,q)[i,j] = xpad[s*i+p, s*j+q]).
    o_ref:   (Ho, Wo, Cout_p) dense output (cropped in-kernel).
    """
    s = stride
    ho, wo, cout = o_ref.shape
    rows = ho * wph_al
    acc = jnp.zeros((rows, cout), jnp.float32)
    for dy in range(3):
        for dx in range(3):
            phase = (dy % s) * s + (dx % s)
            off = (dy // s) * wph_al + (dx // s)   # static, wph_al % 8 == 0
            lhs = xph_ref[phase, pl.ds(off, rows), :]
            acc = acc + jnp.dot(lhs, w_ref[dy * 3 + dx],
                                preferred_element_type=jnp.float32)
    y = jnp.maximum(acc * scale_ref[...] + bias_ref[...], 0.0)
    o_ref[...] = y.reshape(ho, wph_al, cout)[:, :wo, :].astype(o_ref.dtype)


# ----------------------------- kernel wrappers ------------------------------

def _fused_matmul_bn(x2d, w, scale, bias, *, relu=True, residual=None,
                     proj=None, out_dtype=jnp.bfloat16):
    """M-tiled fused (1x1 conv as matmul) + BN [+ residual / fused projection].

    Ragged grid: the last tile's out-of-bounds rows read garbage and write
    nothing (Pallas clips the store); the epilogue is strictly row-local so no
    garbage leaks into kept rows.
    """
    M, K = x2d.shape
    C = w.shape[1]
    tile_m = min(_MAX_TILE_M, _round_up(M, 8))
    if proj is not None and C >= 1024:
        tile_m = min(tile_m, 256)     # v5e scoped-VMEM headroom at wide stages
    grid = (pl.cdiv(M, tile_m),)

    def row_spec(k):
        return pl.BlockSpec((tile_m, k), lambda i: (i, 0))

    def full_spec(shp):
        return pl.BlockSpec(shp, lambda i: (0,) * len(shp))

    in_specs = [row_spec(K), full_spec((K, C)), full_spec((1, C)), full_spec((1, C))]
    args = [x2d, w, scale, bias]
    flops = 2 * M * K * C
    bytes_acc = M * K * 2 + K * C * 2 + M * C * jnp.dtype(out_dtype).itemsize

    if proj is not None:
        xs, wsc, ssc, bsc = proj
        Kp = xs.shape[1]
        in_specs += [row_spec(Kp), full_spec((Kp, C)),
                     full_spec((1, C)), full_spec((1, C))]
        args += [xs, wsc, ssc, bsc]
        kernel = _mm_bn_proj_add_relu_kernel
        flops += 2 * M * Kp * C
        bytes_acc += M * Kp * 2 + Kp * C * 2
    elif residual is not None:
        in_specs.append(row_spec(C))
        args.append(residual)
        kernel = _mm_bn_res_add_relu_kernel
        bytes_acc += M * C * 2
    else:
        kernel = functools.partial(_mm_bn_act_kernel, relu=relu)

    return pl.pallas_call(
        kernel,
        out_shape=jax.ShapeDtypeStruct((M, C), out_dtype),
        grid=grid,
        in_specs=in_specs,
        out_specs=pl.BlockSpec((tile_m, C), lambda i: (i, 0)),
        compiler_params=pltpu.CompilerParams(
            dimension_semantics=("parallel",),
            vmem_limit_bytes=_VMEM_LIMIT),
        cost_estimate=pl.CostEstimate(flops=int(flops), transcendentals=0,
                                      bytes_accessed=int(bytes_acc)),
    )(*args)


def _conv3x3_s1(y, w2, scale, bias):
    """3x3, pad=1, stride=1 conv + folded BN + ReLU, fully in-kernel.

    y:  (N, H, W, Cin_p) bf16.  Returns ((N*H*W, Cout_p) bf16, H, W).
    """
    N, H, W, cin_p = y.shape
    cout_p = w2.shape[-1]
    wp_al = _round_up(W + 2, 8)                  # aligned per-tap row pitch
    rt = min(H, max(1, 256 // wp_al))            # ~256 matmul rows per step
    nrt = pl.cdiv(H, rt)
    kernel = functools.partial(_conv3x3_s1_kernel, wp_al=wp_al)
    out = pl.pallas_call(
        kernel,
        out_shape=jax.ShapeDtypeStruct((N, H, W, cout_p), jnp.bfloat16),
        grid=(N, nrt),
        in_specs=[pl.BlockSpec((None, H, W, cin_p), lambda n, r: (n, 0, 0, 0)),
                  pl.BlockSpec((9, cin_p, cout_p), lambda n, r: (0, 0, 0)),
                  pl.BlockSpec((1, cout_p), lambda n, r: (0, 0)),
                  pl.BlockSpec((1, cout_p), lambda n, r: (0, 0))],
        out_specs=pl.BlockSpec((None, rt, W, cout_p), lambda n, r: (n, r, 0, 0)),
        scratch_shapes=[pltpu.VMEM(((rt + 3) * wp_al, cin_p), jnp.bfloat16)],
        compiler_params=pltpu.CompilerParams(
            dimension_semantics=("parallel", "arbitrary"),
            vmem_limit_bytes=_VMEM_LIMIT),
    )(y, w2, scale, bias)
    return out.reshape(N * H * W, cout_p), H, W


def _conv3x3_phase(y, w2, scale, bias, stride):
    """Strided 3x3, pad=1 conv + folded BN + ReLU (stage-transition blocks)."""
    N, H, W, cin_p = y.shape
    s = stride
    cout_p = w2.shape[-1]
    Ho = (H - 1) // s + 1
    Wo = (W - 1) // s + 1
    Hph = -(-(H + 2) // s)
    wph_al = _round_up(-(-(W + 2) // s), 8)      # aligned phase row pitch
    lp = (Hph + 1) * wph_al

    # TODO(synk): this phase-decomposition pre-pass (pad + 6-D transpose of h1)
    # is one extra HBM pass; an in-kernel strided phase selection would remove
    # it.  Only the (rare) strided blocks take this path.
    yp = jnp.pad(y, ((0, 0),
                     (1, s * (Hph + 1) - H - 1),
                     (1, s * wph_al - W - 1),
                     (0, 0)))
    ph = yp.reshape(N, Hph + 1, s, wph_al, s, cin_p).transpose(0, 2, 4, 1, 3, 5)
    ph = ph.reshape(N, s * s, lp, cin_p)

    kernel = functools.partial(_conv3x3_phase_kernel, stride=s, wph_al=wph_al)
    out = pl.pallas_call(
        kernel,
        out_shape=jax.ShapeDtypeStruct((N, Ho, Wo, cout_p), jnp.bfloat16),
        grid=(N,),
        in_specs=[pl.BlockSpec((None, s * s, lp, cin_p), lambda n: (n, 0, 0, 0)),
                  pl.BlockSpec((9, cin_p, cout_p), lambda n: (0, 0, 0)),
                  pl.BlockSpec((1, cout_p), lambda n: (0, 0)),
                  pl.BlockSpec((1, cout_p), lambda n: (0, 0))],
        out_specs=pl.BlockSpec((None, Ho, Wo, cout_p), lambda n: (n, 0, 0, 0)),
        compiler_params=pltpu.CompilerParams(
            dimension_semantics=("parallel",),
            vmem_limit_bytes=_VMEM_LIMIT),
    )(ph, w2, scale, bias)
    return out.reshape(N * Ho * Wo, cout_p), Ho, Wo


# ------------------------------ JAX glue ----------------------------------

def bn_fold(gamma, beta, mean, var, eps=1e-5):
    scale = gamma / jnp.sqrt(var + eps)
    return scale, beta - mean * scale


def _pad_vec(v, n):
    v = v.astype(jnp.float32)
    return jnp.pad(v, (0, n - v.shape[0])).reshape(1, n)


def _pad_ch(a, cp):
    pad = [(0, 0)] * (a.ndim - 1) + [(0, cp - a.shape[-1])]
    return jnp.pad(a, pad)


# ------------------------------ forward pass --------------------------------

def bottleneck_forward(x_nchw, params, stride):
    expansion = 4
    bf = jnp.bfloat16
    # Cast to bf16 once; transpose NCHW->NHWC in bf16.  This single tensor
    # feeds conv1 and (for projection blocks) the strided shortcut.
    x = jnp.transpose(x_nchw.astype(bf), (0, 2, 3, 1))
    N, H, W, Cin = x.shape
    planes = params["w1"].shape[0]
    Cout = expansion * planes

    p_p = _round_up(planes, _LANE)
    co_p = _round_up(Cout, _LANE)

    s1, b1 = bn_fold(*params["bn1"])
    s2, b2 = bn_fold(*params["bn2"])
    s3, b3 = bn_fold(*params["bn3"])

    # Only *output* channels are lane-padded (padded scale/bias are zero so the
    # padded channels stay exactly zero through every stage); the contraction
    # dim is left as-is (already lane-aligned at real ResNet widths).
    w1 = jnp.pad(params["w1"][:, :, 0, 0].T,
                 ((0, 0), (0, p_p - planes))).astype(bf)
    w2 = jnp.transpose(params["w2"], (2, 3, 1, 0)).reshape(9, planes, planes)
    w2 = jnp.pad(w2, ((0, 0), (0, p_p - planes), (0, p_p - planes))).astype(bf)
    w3 = jnp.pad(params["w3"][:, :, 0, 0].T,
                 ((0, p_p - planes), (0, co_p - Cout))).astype(bf)

    s1p, b1p = _pad_vec(s1, p_p), _pad_vec(b1, p_p)
    s2p, b2p = _pad_vec(s2, p_p), _pad_vec(b2, p_p)
    s3p, b3p = _pad_vec(s3, co_p), _pad_vec(b3, co_p)

    # conv1 (1x1) + bn1 + relu — M-tiled matmul, ragged last tile, no pad pass.
    h1 = _fused_matmul_bn(x.reshape(N * H * W, Cin), w1, s1p, b1p, relu=True)
    h1 = h1.reshape(N, H, W, p_p)

    # conv2 (3x3, stride, pad=1) + bn2 + relu.
    if stride == 1:
        h2, Ho, Wo = _conv3x3_s1(h1, w2, s2p, b2p)
    else:
        h2, Ho, Wo = _conv3x3_phase(h1, w2, s2p, b2p, stride)

    # conv3 (1x1) + bn3 + shortcut + relu — single fused kernel, bf16 output.
    if "wsc" in params:
        ssc, bsc = bn_fold(*params["bnsc"])
        wsc = jnp.pad(params["wsc"][:, :, 0, 0].T,
                      ((0, 0), (0, co_p - Cout))).astype(bf)
        # TODO(synk): fold the stride-s subsample of x into the projection
        # operand's BlockSpec (strided/Element index_map) to avoid this small
        # HBM materialization.
        xs = x[:, ::stride, ::stride, :].reshape(N * Ho * Wo, Cin)
        out = _fused_matmul_bn(h2, w3, s3p, b3p, relu=True,
                               proj=(xs, wsc, _pad_vec(ssc, co_p),
                                     _pad_vec(bsc, co_p)))
    else:
        res = x if Cin == co_p else _pad_ch(x, co_p)
        out = _fused_matmul_bn(h2, w3, s3p, b3p, relu=True,
                               residual=res.reshape(N * H * W, co_p))

    if co_p != Cout:
        out = out[:, :Cout]          # no-op at real ResNet widths (Cout % 128 == 0)
    out = out.reshape(N, Ho, Wo, Cout)
    # Final f32 cast is fused into the layout transpose (kernels emit bf16).
    return jnp.transpose(out, (0, 3, 1, 2)).astype(jnp.float32)


# -------------------------- parameter construction -------------------------

def init_params(key, in_planes, planes, stride):
    expansion = 4
    ks = jax.random.split(key, 8)

    def conv_w(k, cout, cin, kh, kw):
        fan_in = cin * kh * kw
        w = jax.random.normal(k, (cout, cin, kh, kw), jnp.float32) / jnp.sqrt(
            jnp.float32(fan_in))
        # Keep weights bf16-representable so the bf16 kernel path and the f32
        # reference see identical parameters.
        return w.astype(jnp.bfloat16).astype(jnp.float32)

    def bn_p(k, c):
        k1, k2, k3, k4 = jax.random.split(k, 4)
        gamma = 1.0 + 0.1 * jax.random.normal(k1, (c,), jnp.float32)
        beta = 0.1 * jax.random.normal(k2, (c,), jnp.float32)
        mean = 0.1 * jax.random.normal(k3, (c,), jnp.float32)
        var = jnp.abs(jax.random.normal(k4, (c,), jnp.float32)) + 0.5
        return (gamma, beta, mean, var)

    params = {
        "w1": conv_w(ks[0], planes, in_planes, 1, 1),
        "bn1": bn_p(ks[1], planes),
        "w2": conv_w(ks[2], planes, planes, 3, 3),
        "bn2": bn_p(ks[3], planes),
        "w3": conv_w(ks[4], expansion * planes, planes, 1, 1),
        "bn3": bn_p(ks[5], expansion * planes),
    }
    if stride != 1 or in_planes != expansion * planes:
        params["wsc"] = conv_w(ks[6], expansion * planes, in_planes, 1, 1)
        params["bnsc"] = bn_p(ks[7], expansion * planes)
    return params


# ----------------------------- pure-JAX reference ---------------------------

def reference_forward(x_nchw, params, stride):
    def conv(x, w, st, pad):
        w_hwio = jnp.transpose(w, (2, 3, 1, 0))
        return jax.lax.conv_general_dilated(
            x, w_hwio, (st, st), [(pad, pad), (pad, pad)],
            dimension_numbers=("NHWC", "HWIO", "NHWC"))

    def bn(x, p):
        s, b = bn_fold(*p)
        return x * s + b

    x = jnp.transpose(x_nchw, (0, 2, 3, 1)).astype(jnp.float32)
    out = jax.nn.relu(bn(conv(x, params["w1"], 1, 0), params["bn1"]))
    out = jax.nn.relu(bn(conv(out, params["w2"], stride, 1), params["bn2"]))
    out = bn(conv(out, params["w3"], 1, 0), params["bn3"])
    if "wsc" in params:
        sc = bn(conv(x, params["wsc"], stride, 0), params["bnsc"])
    else:
        sc = x
    out = jax.nn.relu(out + sc)
    return jnp.transpose(out, (0, 3, 1, 2))


# ---------------------------------- main ------------------------------------

if __name__ == "__main__":
    key = jax.random.PRNGKey(0)
    fwd = jax.jit(bottleneck_forward, static_argnames=("stride",))
    ref_fwd = jax.jit(reference_forward, static_argnames=("stride",))

    configs = [
        # (in_planes, planes, stride, H, W)
        (16, 8, 2, 8, 8),   # projection shortcut (stride 2) — phase conv path
        (32, 8, 1, 8, 8),   # identity shortcut — fully in-kernel conv path
    ]
    for idx, (in_planes, planes, stride, H, W) in enumerate(configs):
        k_x, k_p = jax.random.split(jax.random.fold_in(key, idx))
        x = jax.random.normal(k_x, (2, in_planes, H, W), jnp.float32)
        x = x.astype(jnp.bfloat16).astype(jnp.float32)   # bf16-representable
        params = init_params(k_p, in_planes, planes, stride)

        out = jax.block_until_ready(fwd(x, params, stride=stride))
        ref = jax.block_until_ready(ref_fwd(x, params, stride=stride))

        Ho = (H - 1) // stride + 1
        Wo = (W - 1) // stride + 1
        assert out.shape == ref.shape == (2, 4 * planes, Ho, Wo), out.shape
        max_err = float(jnp.max(jnp.abs(out - ref)))
        assert jnp.allclose(out, ref, atol=5e-2, rtol=5e-2), max_err

    print("KERNEL_OK")
</pallas_src>

<mosaic_0001>
module attributes {stable_mosaic.version = 11 : i64} {
  func.func @_mm_bn_act_kernel(%arg0: i32, %arg1: memref<128x16xbf16, #tpu.memory_space<vmem>>, %arg2: memref<16x128xbf16, #tpu.memory_space<vmem>>, %arg3: memref<1x128xf32, #tpu.memory_space<vmem>>, %arg4: memref<1x128xf32, #tpu.memory_space<vmem>>, %arg5: memref<128x128xbf16, #tpu.memory_space<vmem>>) attributes {dimension_semantics = [#tpu.dimension_semantics<parallel>], iteration_bounds = array<i64: 1>, scalar_prefetch = 0 : i64, scratch_operands = 0 : i64, tpu.core_type = #tpu.core_type<tc>, window_params = [{transform_indices = @transform_0, window_bounds = array<i64: 128, 16>}, {pipeline_mode = #tpu.pipeline_mode<synchronous>, transform_indices = @transform_1, window_bounds = array<i64: 16, 128>}, {pipeline_mode = #tpu.pipeline_mode<synchronous>, transform_indices = @transform_2, window_bounds = array<i64: 1, 128>}, {pipeline_mode = #tpu.pipeline_mode<synchronous>, transform_indices = @transform_3, window_bounds = array<i64: 1, 128>}, {transform_indices = @transform_4, window_bounds = array<i64: 128, 128>}]} {
    %c0 = arith.constant 0 : index
    %c0_0 = arith.constant 0 : index
    %0 = vector.load %arg1[%c0, %c0_0] : memref<128x16xbf16, #tpu.memory_space<vmem>>, vector<128x16xbf16>
    %c0_1 = arith.constant 0 : index
    %c0_2 = arith.constant 0 : index
    %1 = vector.load %arg2[%c0_1, %c0_2] : memref<16x128xbf16, #tpu.memory_space<vmem>>, vector<16x128xbf16>
    %cst = arith.constant dense<0.000000e+00> : vector<128x128xf32>
    %2 = tpu.matmul %0, %1, %cst {dimension_numbers = #tpu.dot_dimension_numbers<[1], [0], [0], [1], [0, 0, 1, 1], [], []>} : vector<128x16xbf16>, vector<16x128xbf16>, vector<128x128xf32> -> vector<128x128xf32>
    %c0_3 = arith.constant 0 : index
    %c0_4 = arith.constant 0 : index
    %3 = vector.load %arg3[%c0_3, %c0_4] : memref<1x128xf32, #tpu.memory_space<vmem>>, vector<1x128xf32>
    %4 = vector.broadcast %3 : vector<1x128xf32> to vector<128x128xf32>
    %5 = arith.mulf %2, %4 : vector<128x128xf32>
    %c0_5 = arith.constant 0 : index
    %c0_6 = arith.constant 0 : index
    %6 = vector.load %arg4[%c0_5, %c0_6] : memref<1x128xf32, #tpu.memory_space<vmem>>, vector<1x128xf32>
    %7 = vector.broadcast %6 : vector<1x128xf32> to vector<128x128xf32>
    %8 = arith.addf %5, %7 : vector<128x128xf32>
    %cst_7 = arith.constant 0.000000e+00 : f32
    %9 = vector.broadcast %cst_7 : f32 to vector<128x128xf32>
    %10 = arith.maximumf %8, %9 : vector<128x128xf32>
    %11 = arith.truncf %10 : vector<128x128xf32> to vector<128x128xbf16>
    %c0_8 = arith.constant 0 : index
    %c0_9 = arith.constant 0 : index
    %12 = vector.load %arg5[%c0_8, %c0_9] : memref<128x128xbf16, #tpu.memory_space<vmem>>, vector<128x128xbf16>
    tpu.vector_store %arg5[%c0_8, %c0_9], %11 {strides = array<i32>} : memref<128x128xbf16, #tpu.memory_space<vmem>>, vector<128x128xbf16>,
    return
  }
  func.func @transform_0(%arg0: i32) -> (i32, i32) {
    %c0_i32 = arith.constant 0 : i32
    %c0_i32_0 = arith.constant 0 : i32
    return %arg0, %c0_i32 : i32, i32
  }
  func.func @transform_1(%arg0: i32) -> (i32, i32) {
    %c0_i32 = arith.constant 0 : i32
    %c0_i32_0 = arith.constant 0 : i32
    %c0_i32_1 = arith.constant 0 : i32
    return %c0_i32, %c0_i32_0 : i32, i32
  }
  func.func @transform_2(%arg0: i32) -> (i32, i32) {
    %c0_i32 = arith.constant 0 : i32
    %c0_i32_0 = arith.constant 0 : i32
    %c0_i32_1 = arith.constant 0 : i32
    return %c0_i32, %c0_i32_0 : i32, i32
  }
  func.func @transform_3(%arg0: i32) -> (i32, i32) {
    %c0_i32 = arith.constant 0 : i32
    %c0_i32_0 = arith.constant 0 : i32
    %c0_i32_1 = arith.constant 0 : i32
    return %c0_i32, %c0_i32_0 : i32, i32
  }
  func.func @transform_4(%arg0: i32) -> (i32, i32) {
    %c0_i32 = arith.constant 0 : i32
    %c0_i32_0 = arith.constant 0 : i32
    return %arg0, %c0_i32 : i32, i32
  }
}

module attributes {stable_mosaic.version = 11 : i64} {
  func.func @_conv3x3_phase_kernel(%arg0: i32, %arg1: memref<1x4x48x128xbf16, #tpu.memory_space<vmem>>, %arg2: memref<9x128x128xbf16, #tpu.memory_space<vmem>>, %arg3: memref<1x128xf32, #tpu.memory_space<vmem>>, %arg4: memref<1x128xf32, #tpu.memory_space<vmem>>, %arg5: memref<1x4x4x128xbf16, #tpu.memory_space<vmem>>) attributes {dimension_semantics = [#tpu.dimension_semantics<parallel>], iteration_bounds = array<i64: 2>, scalar_prefetch = 0 : i64, scratch_operands = 0 : i64, tpu.core_type = #tpu.core_type<tc>, window_params = [{transform_indices = @transform_0, window_bounds = array<i64: 1, 4, 48, 128>}, {pipeline_mode = #tpu.pipeline_mode<synchronous>, transform_indices = @transform_1, window_bounds = array<i64: 9, 128, 128>}, {pipeline_mode = #tpu.pipeline_mode<synchronous>, transform_indices = @transform_2, window_bounds = array<i64: 1, 128>}, {pipeline_mode = #tpu.pipeline_mode<synchronous>, transform_indices = @transform_3, window_bounds = array<i64: 1, 128>}, {transform_indices = @transform_4, window_bounds = array<i64: 1, 4, 4, 128>}]} {
    %cst = arith.constant 0.000000e+00 : f32
    %0 = vector.broadcast %cst : f32 to vector<32x128xf32>
    %c0 = arith.constant 0 : index
    %c0_0 = arith.constant 0 : index
    %c0_1 = arith.constant 0 : index
    %c0_2 = arith.constant 0 : index
    %1 = vector.load %arg1[%c0, %c0_0, %c0_1, %c0_2] : memref<1x4x48x128xbf16, #tpu.memory_space<vmem>>, vector<1x1x32x128xbf16>
    %2 = vector.shape_cast %1 : vector<1x1x32x128xbf16> to vector<32x128xbf16>
    %c0_3 = arith.constant 0 : index
    %c0_4 = arith.constant 0 : index
    %c0_5 = arith.constant 0 : index
    %3 = vector.load %arg2[%c0_3, %c0_4, %c0_5] : memref<9x128x128xbf16, #tpu.memory_space<vmem>>, vector<1x128x128xbf16>
    %4 = vector.shape_cast %3 : vector<1x128x128xbf16> to vector<128x128xbf16>
    %cst_6 = arith.constant dense<0.000000e+00> : vector<32x128xf32>
    %5 = tpu.matmul %2, %4, %cst_6 {dimension_numbers = #tpu.dot_dimension_numbers<[1], [0], [0], [1], [0, 0, 1, 1], [], []>} : vector<32x128xbf16>, vector<128x128xbf16>, vector<32x128xf32> -> vector<32x128xf32>
    %6 = arith.addf %0, %5 : vector<32x128xf32>
    %c0_7 = arith.constant 0 : index
    %c1 = arith.constant 1 : index
    %c0_8 = arith.constant 0 : index
    %c0_9 = arith.constant 0 : index
    %7 = vector.load %arg1[%c0_7, %c1, %c0_8, %c0_9] : memref<1x4x48x128xbf16, #tpu.memory_space<vmem>>, vector<1x1x32x128xbf16>
    %8 = vector.shape_cast %7 : vector<1x1x32x128xbf16> to vector<32x128xbf16>
    %c1_10 = arith.constant 1 : index
    %c0_11 = arith.constant 0 : index
    %c0_12 = arith.constant 0 : index
    %9 = vector.load %arg2[%c1_10, %c0_11, %c0_12] : memref<9x128x128xbf16, #tpu.memory_space<vmem>>, vector<1x128x128xbf16>
    %10 = vector.shape_cast %9 : vector<1x128x128xbf16> to vector<128x128xbf16>
    %cst_13 = arith.constant dense<0.000000e+00> : vector<32x128xf32>
    %11 = tpu.matmul %8, %10, %cst_13 {dimension_numbers = #tpu.dot_dimension_numbers<[1], [0], [0], [1], [0, 0, 1, 1], [], []>} : vector<32x128xbf16>, vector<128x128xbf16>, vector<32x128xf32> -> vector<32x128xf32>
    %12 = arith.addf %6, %11 : vector<32x128xf32>
    %c0_14 = arith.constant 0 : index
    %c0_15 = arith.constant 0 : index
    %c1_16 = arith.constant 1 : index
    %c0_17 = arith.constant 0 : index
    %13 = vector.load %arg1[%c0_14, %c0_15, %c1_16, %c0_17] : memref<1x4x48x128xbf16, #tpu.memory_space<vmem>>, vector<1x1x32x128xbf16>
    %14 = vector.shape_cast %13 : vector<1x1x32x128xbf16> to vector<32x128xbf16>
    %c2 = arith.constant 2 : index
    %c0_18 = arith.constant 0 : index
    %c0_19 = arith.constant 0 : index
    %15 = vector.load %arg2[%c2, %c0_18, %c0_19] : memref<9x128x128xbf16, #tpu.memory_space<vmem>>, vector<1x128x128xbf16>
    %16 = vector.shape_cast %15 : vector<1x128x128xbf16> to vector<128x128xbf16>
    %cst_20 = arith.constant dense<0.000000e+00> : vector<32x128xf32>
    %17 = tpu.matmul %14, %16, %cst_20 {dimension_numbers = #tpu.dot_dimension_numbers<[1], [0], [0], [1], [0, 0, 1, 1], [], []>} : vector<32x128xbf16>, vector<128x128xbf16>, vector<32x128xf32> -> vector<32x128xf32>
    %18 = arith.addf %12, %17 : vector<32x128xf32>
    %c0_21 = arith.constant 0 : index
    %c2_22 = arith.constant 2 : index
    %c0_23 = arith.constant 0 : index
    %c0_24 = arith.constant 0 : index
    %19 = vector.load %arg1[%c0_21, %c2_22, %c0_23, %c0_24] : memref<1x4x48x128xbf16, #tpu.memory_space<vmem>>, vector<1x1x32x128xbf16>
    %20 = vector.shape_cast %19 : vector<1x1x32x128xbf16> to vector<32x128xbf16>
    %c3 = arith.constant 3 : index
    %c0_25 = arith.constant 0 : index
    %c0_26 = arith.constant 0 : index
    %21 = vector.load %arg2[%c3, %c0_25, %c0_26] : memref<9x128x128xbf16, #tpu.memory_space<vmem>>, vector<1x128x128xbf16>
    %22 = vector.shape_cast %21 : vector<1x128x128xbf16> to vector<128x128xbf16>
    %cst_27 = arith.constant dense<0.000000e+00> : vector<32x128xf32>
    %23 = tpu.matmul %20, %22, %cst_27 {dimension_numbers = #tpu.dot_dimension_numbers<[1], [0], [0], [1], [0, 0, 1, 1], [], []>} : vector<32x128xbf16>, vector<128x128xbf16>, vector<32x128xf32> -> vector<32x128xf32>
    %24 = arith.addf %18, %23 : vector<32x128xf32>
    %c0_28 = arith.constant 0 : index
    %c3_29 = arith.constant 3 : index
    %c0_30 = arith.constant 0 : index
    %c0_31 = arith.constant 0 : index
    %25 = vector.load %arg1[%c0_28, %c3_29, %c0_30, %c0_31] : memref<1x4x48x128xbf16, #tpu.memory_space<vmem>>, vector<1x1x32x128xbf16>
    %26 = vector.shape_cast %25 : vector<1x1x32x128xbf16> to vector<32x128xbf16>
    %c4 = arith.constant 4 : index
    %c0_32 = arith.constant 0 : index
    %c0_33 = arith.constant 0 : index
    %27 = vector.load %arg2[%c4, %c0_32, %c0_33] : memref<9x128x128xbf16, #tpu.memory_space<vmem>>, vector<1x128x128xbf16>
    %28 = vector.shape_cast %27 : vector<1x128x128xbf16> to vector<128x128xbf16>
    %cst_34 = arith.constant dense<0.000000e+00> : vector<32x128xf32>
    %29 = tpu.matmul %26, %28, %cst_34 {dimension_numbers = #tpu.dot_dimension_numbers<[1], [0], [0], [1], [0, 0, 1, 1], [], []>} : vector<32x128xbf16>, vector<128x128xbf16>, vector<32x128xf32> -> vector<32x128xf32>
    %30 = arith.addf %24, %29 : vector<32x128xf32>
    %c0_35 = arith.constant 0 : index
    %c2_36 = arith.constant 2 : index
    %c1_37 = arith.constant 1 : index
    %c0_38 = arith.constant 0 : index
    %31 = vector.load %arg1[%c0_35, %c2_36, %c1_37, %c0_38] : memref<1x4x48x128xbf16, #tpu.memory_space<vmem>>, vector<1x1x32x128xbf16>
    %32 = vector.shape_cast %31 : vector<1x1x32x128xbf16> to vector<32x128xbf16>
    %c5 = arith.constant 5 : index
    %c0_39 = arith.constant 0 : index
    %c0_40 = arith.constant 0 : index
    %33 = vector.load %arg2[%c5, %c0_39, %c0_40] : memref<9x128x128xbf16, #tpu.memory_space<vmem>>, vector<1x128x128xbf16>
    %34 = vector.shape_cast %33 : vector<1x128x128xbf16> to vector<128x128xbf16>
    %cst_41 = arith.constant dense<0.000000e+00> : vector<32x128xf32>
    %35 = tpu.matmul %32, %34, %cst_41 {dimension_numbers = #tpu.dot_dimension_numbers<[1], [0], [0], [1], [0, 0, 1, 1], [], []>} : vector<32x128xbf16>, vector<128x128xbf16>, vector<32x128xf32> -> vector<32x128xf32>
    %36 = arith.addf %30, %35 : vector<32x128xf32>
    %c0_42 = arith.constant 0 : index
    %c0_43 = arith.constant 0 : index
    %c8 = arith.constant 8 : index
    %c0_44 = arith.constant 0 : index
    %37 = vector.load %arg1[%c0_42, %c0_43, %c8, %c0_44] : memref<1x4x48x128xbf16, #tpu.memory_space<vmem>>, vector<1x1x32x128xbf16>
    %38 = vector.shape_cast %37 : vector<1x1x32x128xbf16> to vector<32x128xbf16>
    %c6 = arith.constant 6 : index
    %c0_45 = arith.constant 0 : index
    %c0_46 = arith.constant 0 : index
    %39 = vector.load %arg2[%c6, %c0_45, %c0_46] : memref<9x128x128xbf16, #tpu.memory_space<vmem>>, vector<1x128x128xbf16>
    %40 = vector.shape_cast %39 : vector<1x128x128xbf16> to vector<128x128xbf16>
    %cst_47 = arith.constant dense<0.000000e+00> : vector<32x128xf32>
    %41 = tpu.matmul %38, %40, %cst_47 {dimension_numbers = #tpu.dot_dimension_numbers<[1], [0], [0], [1], [0, 0, 1, 1], [], []>} : vector<32x128xbf16>, vector<128x128xbf16>, vector<32x128xf32> -> vector<32x128xf32>
    %42 = arith.addf %36, %41 : vector<32x128xf32>
    %c0_48 = arith.constant 0 : index
    %c1_49 = arith.constant 1 : index
    %c8_50 = arith.constant 8 : index
    %c0_51 = arith.constant 0 : index
    %43 = vector.load %arg1[%c0_48, %c1_49, %c8_50, %c0_51] : memref<1x4x48x128xbf16, #tpu.memory_space<vmem>>, vector<1x1x32x128xbf16>
    %44 = vector.shape_cast %43 : vector<1x1x32x128xbf16> to vector<32x128xbf16>
    %c7 = arith.constant 7 : index
    %c0_52 = arith.constant 0 : index
    %c0_53 = arith.constant 0 : index
    %45 = vector.load %arg2[%c7, %c0_52, %c0_53] : memref<9x128x128xbf16, #tpu.memory_space<vmem>>, vector<1x128x128xbf16>
    %46 = vector.shape_cast %45 : vector<1x128x128xbf16> to vector<128x128xbf16>
    %cst_54 = arith.constant dense<0.000000e+00> : vector<32x128xf32>
    %47 = tpu.matmul %44, %46, %cst_54 {dimension_numbers = #tpu.dot_dimension_numbers<[1], [0], [0], [1], [0, 0, 1, 1], [], []>} : vector<32x128xbf16>, vector<128x128xbf16>, vector<32x128xf32> -> vector<32x128xf32>
    %48 = arith.addf %42, %47 : vector<32x128xf32>
    %c0_55 = arith.constant 0 : index
    %c0_56 = arith.constant 0 : index
    %c9 = arith.constant 9 : index
    %c0_57 = arith.constant 0 : index
    %49 = vector.load %arg1[%c0_55, %c0_56, %c9, %c0_57] : memref<1x4x48x128xbf16, #tpu.memory_space<vmem>>, vector<1x1x32x128xbf16>
    %50 = vector.shape_cast %49 : vector<1x1x32x128xbf16> to vector<32x128xbf16>
    %c8_58 = arith.constant 8 : index
    %c0_59 = arith.constant 0 : index
    %c0_60 = arith.constant 0 : index
    %51 = vector.load %arg2[%c8_58, %c0_59, %c0_60] : memref<9x128x128xbf16, #tpu.memory_space<vmem>>, vector<1x128x128xbf16>
    %52 = vector.shape_cast %51 : vector<1x128x128xbf16> to vector<128x128xbf16>
    %cst_61 = arith.constant dense<0.000000e+00> : vector<32x128xf32>
    %53 = tpu.matmul %50, %52, %cst_61 {dimension_numbers = #tpu.dot_dimension_numbers<[1], [0], [0], [1], [0, 0, 1, 1], [], []>} : vector<32x128xbf16>, vector<128x128xbf16>, vector<32x128xf32> -> vector<32x128xf32>
    %54 = arith.addf %48, %53 : vector<32x128xf32>
    %c0_62 = arith.constant 0 : index
    %c0_63 = arith.constant 0 : index
    %55 = vector.load %arg3[%c0_62, %c0_63] : memref<1x128xf32, #tpu.memory_space<vmem>>, vector<1x128xf32>
    %56 = vector.broadcast %55 : vector<1x128xf32> to vector<32x128xf32>
    %57 = arith.mulf %54, %56 : vector<32x128xf32>
    %c0_64 = arith.constant 0 : index
    %c0_65 = arith.constant 0 : index
    %58 = vector.load %arg4[%c0_64, %c0_65] : memref<1x128xf32, #tpu.memory_space<vmem>>, vector<1x128xf32>
    %59 = vector.broadcast %58 : vector<1x128xf32> to vector<32x128xf32>
    %60 = arith.addf %57, %59 : vector<32x128xf32>
    %cst_66 = arith.constant 0.000000e+00 : f32
    %61 = vector.broadcast %cst_66 : f32 to vector<32x128xf32>
    %62 = arith.maximumf %60, %61 : vector<32x128xf32>
    %63 = vector.shape_cast %62 : vector<32x128xf32> to vector<4x8x128xf32>
    %64 = vector.extract_strided_slice %63 {offsets = [0, 0, 0], sizes = [4, 4, 128], strides = [1, 1, 1]} : vector<4x8x128xf32> to vector<4x4x128xf32>
    %65 = arith.truncf %64 : vector<4x4x128xf32> to vector<4x4x128xbf16>
    %c0_67 = arith.constant 0 : index
    %c0_68 = arith.constant 0 : index
    %c0_69 = arith.constant 0 : index
    %c0_70 = arith.constant 0 : index
    %66 = vector.load %arg5[%c0_67, %c0_68, %c0_69, %c0_70] : memref<1x4x4x128xbf16, #tpu.memory_space<vmem>>, vector<1x4x4x128xbf16>
    %67 = vector.shape_cast %66 : vector<1x4x4x128xbf16> to vector<4x4x128xbf16>
    %68 = vector.shape_cast %65 : vector<4x4x128xbf16> to vector<1x4x4x128xbf16>
    tpu.vector_store %arg5[%c0_67, %c0_68, %c0_69, %c0_70], %68 {strides = array<i32>} : memref<1x4x4x128xbf16, #tpu.memory_space<vmem>>, vector<1x4x4x128xbf16>,
    return
  }
  func.func @transform_0(%arg0: i32) -> (i32, i32, i32, i32) {
    %c0_i32 = arith.constant 0 : i32
    %c0_i32_0 = arith.constant 0 : i32
    %c0_i32_1 = arith.constant 0 : i32
    %c0_i32_2 = arith.constant 0 : i32
    return %arg0, %c0_i32, %c0_i32_0, %c0_i32_1 : i32, i32, i32, i32
  }
  func.func @transform_1(%arg0: i32) -> (i32, i32, i32) {
    %c0_i32 = arith.constant 0 : i32
    %c0_i32_0 = arith.constant 0 : i32
    %c0_i32_1 = arith.constant 0 : i32
    %c0_i32_2 = arith.constant 0 : i32
    return %c0_i32, %c0_i32_0, %c0_i32_1 : i32, i32, i32
  }
  func.func @transform_2(%arg0: i32) -> (i32, i32) {
    %c0_i32 = arith.constant 0 : i32
    %c0_i32_0 = arith.constant 0 : i32
    %c0_i32_1 = arith.constant 0 : i32
    return %c0_i32, %c0_i32_0 : i32, i32
  }
  func.func @transform_3(%arg0: i32) -> (i32, i32) {
    %c0_i32 = arith.constant 0 : i32
    %c0_i32_0 = arith.constant 0 : i32
    %c0_i32_1 = arith.constant 0 : i32
    return %c0_i32, %c0_i32_0 : i32, i32
  }
  func.func @transform_4(%arg0: i32) -> (i32, i32, i32, i32) {
    %c0_i32 = arith.constant 0 : i32
    %c0_i32_0 = arith.constant 0 : i32
    %c0_i32_1 = arith.constant 0 : i32
    %c0_i32_2 = arith.constant 0 : i32
    return %arg0, %c0_i32, %c0_i32_0, %c0_i32_1 : i32, i32, i32, i32
  }
}

module attributes {stable_mosaic.version = 11 : i64} {
  func.func @_mm_bn_proj_add_relu_kernel(%arg0: i32, %arg1: memref<32x128xbf16, #tpu.memory_space<vmem>>, %arg2: memref<128x128xbf16, #tpu.memory_space<vmem>>, %arg3: memref<1x128xf32, #tpu.memory_space<vmem>>, %arg4: memref<1x128xf32, #tpu.memory_space<vmem>>, %arg5: memref<32x16xbf16, #tpu.memory_space<vmem>>, %arg6: memref<16x128xbf16, #tpu.memory_space<vmem>>, %arg7: memref<1x128xf32, #tpu.memory_space<vmem>>, %arg8: memref<1x128xf32, #tpu.memory_space<vmem>>, %arg9: memref<32x128xbf16, #tpu.memory_space<vmem>>) attributes {dimension_semantics = [#tpu.dimension_semantics<parallel>], iteration_bounds = array<i64: 1>, scalar_prefetch = 0 : i64, scratch_operands = 0 : i64, tpu.core_type = #tpu.core_type<tc>, window_params = [{transform_indices = @transform_0, window_bounds = array<i64: 32, 128>}, {pipeline_mode = #tpu.pipeline_mode<synchronous>, transform_indices = @transform_1, window_bounds = array<i64: 128, 128>}, {pipeline_mode = #tpu.pipeline_mode<synchronous>, transform_indices = @transform_2, window_bounds = array<i64: 1, 128>}, {pipeline_mode = #tpu.pipeline_mode<synchronous>, transform_indices = @transform_3, window_bounds = array<i64: 1, 128>}, {transform_indices = @transform_4, window_bounds = array<i64: 32, 16>}, {pipeline_mode = #tpu.pipeline_mode<synchronous>, transform_indices = @transform_5, window_bounds = array<i64: 16, 128>}, {pipeline_mode = #tpu.pipeline_mode<synchronous>, transform_indices = @transform_6, window_bounds = array<i64: 1, 128>}, {pipeline_mode = #tpu.pipeline_mode<synchronous>, transform_indices = @transform_7, window_bounds = array<i64: 1, 128>}, {transform_indices = @transform_8, window_bounds = array<i64: 32, 128>}]} {
    %c0 = arith.constant 0 : index
    %c0_0 = arith.constant 0 : index
    %0 = vector.load %arg1[%c0, %c0_0] : memref<32x128xbf16, #tpu.memory_space<vmem>>, vector<32x128xbf16>
    %c0_1 = arith.constant 0 : index
    %c0_2 = arith.constant 0 : index
    %1 = vector.load %arg2[%c0_1, %c0_2] : memref<128x128xbf16, #tpu.memory_space<vmem>>, vector<128x128xbf16>
    %cst = arith.constant dense<0.000000e+00> : vector<32x128xf32>
    %2 = tpu.matmul %0, %1, %cst {dimension_numbers = #tpu.dot_dimension_numbers<[1], [0], [0], [1], [0, 0, 1, 1], [], []>} : vector<32x128xbf16>, vector<128x128xbf16>, vector<32x128xf32> -> vector<32x128xf32>
    %c0_3 = arith.constant 0 : index
    %c0_4 = arith.constant 0 : index
    %3 = vector.load %arg3[%c0_3, %c0_4] : memref<1x128xf32, #tpu.memory_space<vmem>>, vector<1x128xf32>
    %4 = vector.broadcast %3 : vector<1x128xf32> to vector<32x128xf32>
    %5 = arith.mulf %2, %4 : vector<32x128xf32>
    %c0_5 = arith.constant 0 : index
    %c0_6 = arith.constant 0 : index
    %6 = vector.load %arg4[%c0_5, %c0_6] : memref<1x128xf32, #tpu.memory_space<vmem>>, vector<1x128xf32>
    %7 = vector.broadcast %6 : vector<1x128xf32> to vector<32x128xf32>
    %8 = arith.addf %5, %7 : vector<32x128xf32>
    %c0_7 = arith.constant 0 : index
    %c0_8 = arith.constant 0 : index
    %9 = vector.load %arg5[%c0_7, %c0_8] : memref<32x16xbf16, #tpu.memory_space<vmem>>, vector<32x16xbf16>
    %c0_9 = arith.constant 0 : index
    %c0_10 = arith.constant 0 : index
    %10 = vector.load %arg6[%c0_9, %c0_10] : memref<16x128xbf16, #tpu.memory_space<vmem>>, vector<16x128xbf16>
    %cst_11 = arith.constant dense<0.000000e+00> : vector<32x128xf32>
    %11 = tpu.matmul %9, %10, %cst_11 {dimension_numbers = #tpu.dot_dimension_numbers<[1], [0], [0], [1], [0, 0, 1, 1], [], []>} : vector<32x16xbf16>, vector<16x128xbf16>, vector<32x128xf32> -> vector<32x128xf32>
    %c0_12 = arith.constant 0 : index
    %c0_13 = arith.constant 0 : index
    %12 = vector.load %arg7[%c0_12, %c0_13] : memref<1x128xf32, #tpu.memory_space<vmem>>, vector<1x128xf32>
    %13 = vector.broadcast %12 : vector<1x128xf32> to vector<32x128xf32>
    %14 = arith.mulf %11, %13 : vector<32x128xf32>
    %c0_14 = arith.constant 0 : index
    %c0_15 = arith.constant 0 : index
    %15 = vector.load %arg8[%c0_14, %c0_15] : memref<1x128xf32, #tpu.memory_space<vmem>>, vector<1x128xf32>
    %16 = vector.broadcast %15 : vector<1x128xf32> to vector<32x128xf32>
    %17 = arith.addf %14, %16 : vector<32x128xf32>
    %18 = arith.addf %8, %17 : vector<32x128xf32>
    %cst_16 = arith.constant 0.000000e+00 : f32
    %19 = vector.broadcast %cst_16 : f32 to vector<32x128xf32>
    %20 = arith.maximumf %18, %19 : vector<32x128xf32>
    %21 = arith.truncf %20 : vector<32x128xf32> to vector<32x128xbf16>
    %c0_17 = arith.constant 0 : index
    %c0_18 = arith.constant 0 : index
    %22 = vector.load %arg9[%c0_17, %c0_18] : memref<32x128xbf16, #tpu.memory_space<vmem>>, vector<32x128xbf16>
    tpu.vector_store %arg9[%c0_17, %c0_18], %21 {strides = array<i32>} : memref<32x128xbf16, #tpu.memory_space<vmem>>, vector<32x128xbf16>,
    return
  }
  func.func @transform_0(%arg0: i32) -> (i32, i32) {
    %c0_i32 = arith.constant 0 : i32
    %c0_i32_0 = arith.constant 0 : i32
    return %arg0, %c0_i32 : i32, i32
  }
  func.func @transform_1(%arg0: i32) -> (i32, i32) {
    %c0_i32 = arith.constant 0 : i32
    %c0_i32_0 = arith.constant 0 : i32
    %c0_i32_1 = arith.constant 0 : i32
    return %c0_i32, %c0_i32_0 : i32, i32
  }
  func.func @transform_2(%arg0: i32) -> (i32, i32) {
    %c0_i32 = arith.constant 0 : i32
    %c0_i32_0 = arith.constant 0 : i32
    %c0_i32_1 = arith.constant 0 : i32
    return %c0_i32, %c0_i32_0 : i32, i32
  }
  func.func @transform_3(%arg0: i32) -> (i32, i32) {
    %c0_i32 = arith.constant 0 : i32
    %c0_i32_0 = arith.constant 0 : i32
    %c0_i32_1 = arith.constant 0 : i32
    return %c0_i32, %c0_i32_0 : i32, i32
  }
  func.func @transform_4(%arg0: i32) -> (i32, i32) {
    %c0_i32 = arith.constant 0 : i32
    %c0_i32_0 = arith.constant 0 : i32
    return %arg0, %c0_i32 : i32, i32
  }
  func.func @transform_5(%arg0: i32) -> (i32, i32) {
    %c0_i32 = arith.constant 0 : i32
    %c0_i32_0 = arith.constant 0 : i32
    %c0_i32_1 = arith.constant 0 : i32
    return %c0_i32, %c0_i32_0 : i32, i32
  }
  func.func @transform_6(%arg0: i32) -> (i32, i32) {
    %c0_i32 = arith.constant 0 : i32
    %c0_i32_0 = arith.constant 0 : i32
    %c0_i32_1 = arith.constant 0 : i32
    return %c0_i32, %c0_i32_0 : i32, i32
  }
  func.func @transform_7(%arg0: i32) -> (i32, i32) {
    %c0_i32 = arith.constant 0 : i32
    %c0_i32_0 = arith.constant 0 : i32
    %c0_i32_1 = arith.constant 0 : i32
    return %c0_i32, %c0_i32_0 : i32, i32
  }
  func.func @transform_8(%arg0: i32) -> (i32, i32) {
    %c0_i32 = arith.constant 0 : i32
    %c0_i32_0 = arith.constant 0 : i32
    return %arg0, %c0_i32 : i32, i32
  }
}

</mosaic_0001>

<bundles_post_ra>
// kernel: bottleneck_forward.3
= control target key start
LH: loop header
LB: loop body
LE: loop exit
PB: predicated region body
PF: predicated region fallthrough
CT: control target
= control target key end

     0   :  { %vm82_vm0 = vcmask 130048   ;;  %s594_s1 = inlined_call_operand.vmem [shape: bf16[16,128], index: 1, kind: input, shape index: {}]   ;;  %s595_s0 = inlined_call_operand.vmem [shape: bf16[128,16], index: 0, kind: input, shape index: {}]   ;;  %s596_s2 = inlined_call_operand.vmem [shape: f32[1,128], index: 2, kind: input, shape index: {}]   ;;  %s597_s3 = inlined_call_operand.vmem [shape: f32[1,128], index: 3, kind: input, shape index: {}]   ;;  %s598_s4 = inlined_call_operand.vmem [shape: bf16[128,128], index: 4, kind: output, shape index: {}]  }
   0x1   :  { %v477_v0 = vld [vmem:[%s594_s1] sm:$0xff]   ;;  %v480_v3 = vld [vmem:[%s595_s0 + $0x8] sm:$0xff]   ;;  %v482_v5 = vld [vmem:[%s595_s0 + $0x10] sm:$0xff]  }
   0x2   :  { %v478_v1 = vld [vmem:[%s595_s0] sm:$0xff]   ;;  %457 = vmatprep.subr.bf16.mxu0 %v477_v0  ;;  %475 = vmatprep.subr.bf16.mxu1 %v477_v0  ;;  %v481_v4 = vld [vmem:[%s595_s0 + $0x28] sm:$0xff]   ;;  %v483_v6 = vld [vmem:[%s595_s0 + $0x30] sm:$0xff]  }
   0x3   :  { %v479_v2 = vld [vmem:[%s595_s0 + $0x20] sm:$0xff]   ;;  %458 = vmatpush3.bf16.msra.mxu0 %v477_v0  ;;  %476 = vmatpush3.bf16.msra.mxu1 %v477_v0  ;;  %v484_v7 = vld [vmem:[%s595_s0 + $0x18] sm:$0xff]  }
   0x4   :  { %459 = vmatprep.mubr.msk.bf16.mxu0 %vm82_vm0, %v478_v1  ;;  %467 = vmatprep.mubr.msk.bf16.mxu1 %vm82_vm0, %v479_v2  ;;  %v485_v8 = vld [vmem:[%s595_s0 + $0x38] sm:$0xff]   ;;  %v549_v9 = vld [vmem:[%s596_s2] ss:$0 sm:$0xff] }
   0x5   :  { %v368_v14 = vld [vmem:[%s597_s3] ss:$0 sm:$0xff] }
   0x6   :  { %460 = vmatmul.mubr.msk.bf16.vlgmr.msra.gmra.mxu0 %vm82_vm0, %v480_v3  ;;  %468 = vmatmul.mubr.msk.bf16.vlgmr.msra.gmra.mxu1 %vm82_vm0, %v481_v4 }
   0x7   :  { %463 = vmatprep.mubr.msk.bf16.mxu0 %vm82_vm0, %v482_v5  ;;  %471 = vmatprep.mubr.msk.bf16.mxu1 %vm82_vm0, %v483_v6 }
   0xe   :  { %464 = vmatmul.mubr.msk.bf16.gmra.mxu0 %vm82_vm0, %v484_v7  ;;  %472 = vmatmul.mubr.msk.bf16.gmra.mxu1 %vm82_vm0, %v485_v8 }
  0xc6   :  { %v461_v10 = vpop.f32.mrf.mxu0  ;;  %v469_v11 = vpop.f32.mrf.mxu1 }
  0xc7   :  { %v213_v12 = vmul.f32 %v461_v10, %v549_v9  ;;  %v221_v13 = vmul.f32 %v469_v11, %v549_v9 }
  0xc8   :  { %v141_v15 = vpop.f32.mrf.mxu0  ;;  %v173_v16 = vpop.f32.mrf.mxu1 }
  0xc9   :  { %v211_v17 = vmul.f32 %v549_v9, %v141_v15  ;;  %v219_v18 = vmul.f32 %v549_v9, %v173_v16  ;;  %v236_v21 = vadd.f32 %v368_v14, %v213_v12  ;;  %v244_v22 = vadd.f32 %v368_v14, %v221_v13 }
  0xca   :  { %v462_v19 = vpop.f32.mrf.mxu0  ;;  %v470_v20 = vpop.f32.mrf.mxu1 }
  0xcb   :  { %v214_v23 = vmul.f32 %v462_v19, %v549_v9  ;;  %v222_v24 = vmul.f32 %v470_v20, %v549_v9  ;;  %v234_v27 = vadd.f32 %v368_v14, %v211_v17  ;;  %v242_v28 = vadd.f32 %v368_v14, %v219_v18 }
  0xcc   :  { %v144_v25 = vpop.f32.mrf.mxu0  ;;  %v176_v26 = vpop.f32.mrf.mxu1  ;;  %v252_v35 = vmax.f32 %v236_v21, 0.0  ;;  %v260_v36 = vmax.f32 %v244_v22, 0.0 }
  0xcd   :  { %v212_v29 = vmul.f32 %v549_v9, %v144_v25  ;;  %v220_v30 = vmul.f32 %v549_v9, %v176_v26  ;;  %v237_v31 = vadd.f32 %v368_v14, %v214_v23  ;;  %v245_v32 = vadd.f32 %v368_v14, %v222_v24 }
  0xce   :  { %v465_v33 = vpop.f32.mrf.mxu0  ;;  %v473_v34 = vpop.f32.mrf.mxu1  ;;  %v250_v45 = vmax.f32 %v234_v27, 0.0  ;;  %v258_v46 = vmax.f32 %v242_v28, 0.0 }
  0xcf   :  { %v235_v37 = vadd.f32 %v368_v14, %v212_v29  ;;  %v243_v38 = vadd.f32 %v368_v14, %v220_v30  ;;  %v253_v39 = vmax.f32 %v237_v31, 0.0  ;;  %v261_v40 = vmax.f32 %v245_v32, 0.0 }
  0xd0   :  { %v217_v41 = vmul.f32 %v465_v33, %v549_v9  ;;  %v225_v42 = vmul.f32 %v473_v34, %v549_v9  ;;  %v157_v43 = vpop.f32.mrf.mxu0  ;;  %v189_v44 = vpop.f32.mrf.mxu1 }
  0xd1   :  { %v251_v47 = vmax.f32 %v235_v37, 0.0  ;;  %v259_v48 = vmax.f32 %v243_v38, 0.0  ;;  %v409_v49 = vpack.c.bf16 %v253_v39, %v252_v35  ;;  %v429_v50 = vpack.c.bf16 %v261_v40, %v260_v36 }
  0xd2   :  { %v215_v51 = vmul.f32 %v549_v9, %v157_v43  ;;  %v223_v52 = vmul.f32 %v549_v9, %v189_v44  ;;  %v466_v53 = vpop.f32.mrf.mxu0  ;;  %v474_v54 = vpop.f32.mrf.mxu1  ;;  %v240_v57 = vadd.f32 %v368_v14, %v217_v41  ;;  %v248_v58 = vadd.f32 %v368_v14, %v225_v42 }
  0xd3   :  { %v404_v55 = vpack.c.bf16 %v251_v47, %v250_v45  ;;  %v424_v56 = vpack.c.bf16 %v259_v48, %v258_v46  ;;  %441 = vst [vmem:[%s598_s4 + $0x8] sm:$0xff] %v409_v49   ;;  %445 = vst [vmem:[%s598_s4 + $0x28] sm:$0xff] %v429_v50   ;;  %v218_v59 = vmul.f32 %v466_v53, %v549_v9 }
  0xd4   :  { %v226_v60 = vmul.f32 %v474_v54, %v549_v9  ;;  %v160_v61 = vpop.f32.mrf.mxu0  ;;  %v192_v62 = vpop.f32.mrf.mxu1  ;;  %v238_v63 = vadd.f32 %v368_v14, %v215_v51  ;;  %v246_v0 = vadd.f32 %v368_v14, %v223_v52  ;;  %v256_v7 = vmax.f32 %v240_v57, 0.0 }
  0xd5   :  { %405 = vst [vmem:[%s598_s4] sm:$0xff] %v404_v55   ;;  %444 = vst [vmem:[%s598_s4 + $0x20] sm:$0xff] %v424_v56   ;;  %v216_v1 = vmul.f32 %v549_v9, %v160_v61  ;;  %v224_v2 = vmul.f32 %v549_v9, %v192_v62  ;;  %v241_v3 = vadd.f32 %v368_v14, %v218_v59  ;;  %v264_v8 = vmax.f32 %v248_v58, 0.0 }
  0xd6   :  { %v249_v4 = vadd.f32 %v368_v14, %v226_v60  ;;  %v254_v12 = vmax.f32 %v238_v63, 0.0  ;;  %v262_v13 = vmax.f32 %v246_v0, 0.0 }
  0xd7   :  { %v239_v5 = vadd.f32 %v368_v14, %v216_v1  ;;  %v247_v6 = vadd.f32 %v368_v14, %v224_v2  ;;  %v257_v10 = vmax.f32 %v241_v3, 0.0 }
  0xd8   :  { %v265_v11 = vmax.f32 %v249_v4, 0.0 }
  0xd9   :  { %v255_v15 = vmax.f32 %v239_v5, 0.0  ;;  %v263_v16 = vmax.f32 %v247_v6, 0.0  ;;  %v419_v17 = vpack.c.bf16 %v257_v10, %v256_v7 }
  0xda   :  { %v439_v18 = vpack.c.bf16 %v265_v11, %v264_v8 }
  0xdb   :  { %v414_v19 = vpack.c.bf16 %v255_v15, %v254_v12  ;;  %v434_v20 = vpack.c.bf16 %v263_v16, %v262_v13  ;;  %443 = vst [vmem:[%s598_s4 + $0x18] sm:$0xff] %v419_v17  }
  0xdc   :  { %447 = vst [vmem:[%s598_s4 + $0x38] sm:$0xff] %v439_v18  }
  0xdd   :  { %442 = vst [vmem:[%s598_s4 + $0x10] sm:$0xff] %v414_v19   ;;  %446 = vst [vmem:[%s598_s4 + $0x30] sm:$0xff] %v434_v20  }

// kernel: bottleneck_forward.5
= control target key start
LH: loop header
LB: loop body
LE: loop exit
PB: predicated region body
PF: predicated region fallthrough
CT: control target
= control target key end

     0   :  { %vm203_vm0 = vcmask 130048   ;;  %s505_s1 = inlined_call_operand.vmem [shape: bf16[128,128], index: 1, kind: input, shape index: {}]   ;;  %s506_s5 = inlined_call_operand.vmem [shape: bf16[16,128], index: 5, kind: input, shape index: {}]   ;;  %s507_s4 = inlined_call_operand.vmem [shape: bf16[32,16], index: 4, kind: input, shape index: {}]   ;;  %s508_s0 = inlined_call_operand.vmem [shape: bf16[32,128], index: 0, kind: input, shape index: {}]   ;;  %s509_s6 = inlined_call_operand.vmem [shape: f32[1,128], index: 6, kind: input, shape index: {}]   ;;  %s510_s2 = inlined_call_operand.vmem [shape: f32[1,128], index: 2, kind: input, shape index: {}]   ;;  %s511_s7 = inlined_call_operand.vmem [shape: f32[1,128], index: 7, kind: input, shape index: {}]   ;;  %s512_s3 = inlined_call_operand.vmem [shape: f32[1,128], index: 3, kind: input, shape index: {}]   ;;  %s513_s8 = inlined_call_operand.vmem [shape: bf16[32,128], index: 8, kind: output, shape index: {}]  }
   0x1   :  { %v390_v0 = vld [vmem:[%s505_s1 + $0x38] sm:$0xff]   ;;  %v391_v1 = vld [vmem:[%s505_s1 + $0x30] sm:$0xff]   ;;  %v392_v2 = vld [vmem:[%s505_s1 + $0x28] sm:$0xff]  }
   0x2   :  { %364 = vmatprep.subr.bf16.mxu0 %v390_v0  ;;  %v396_v3 = vld [vmem:[%s506_s5] sm:$0xff]   ;;  %v399_v6 = vld [vmem:[%s507_s4 + $0x8] sm:$0xff]   ;;  %v394_v8 = vld [vmem:[%s505_s1 + $0x18] sm:$0xff]  }
   0x3   :  { %365 = vmatpush3.bf16.msra.mxu0 %v390_v0  ;;  %v393_v4 = vld [vmem:[%s505_s1 + $0x20] sm:$0xff]   ;;  %384 = vmatprep.subr.bf16.mxu1 %v396_v3  ;;  %v395_v9 = vld [vmem:[%s505_s1 + $0x10] sm:$0xff]   ;;  %v397_v10 = vld [vmem:[%s505_s1 + $0x8] sm:$0xff]  }
   0x4   :  { %366 = vmatprep.subr.bf16.mxu0 %v391_v1  ;;  %v398_v5 = vld [vmem:[%s507_s4] sm:$0xff]   ;;  %385 = vmatpush3.bf16.msra.mxu1 %v396_v3  ;;  %v402_v12 = vld [vmem:[%s508_s0 + $0x8] sm:$0xff]  }
   0x5   :  { %386 = vmatprep.mubr.msk.bf16.mxu1 %vm203_vm0, %v398_v5  ;;  %v401_v7 = vld [vmem:[%s508_s0] sm:$0xff]  }
   0x6   :  { %380 = vmatprep.mubr.bf16.mxu0 %v401_v7  ;;  %v400_v11 = vld [vmem:[%s505_s1] sm:$0xff]  }
   0x7   :  { %367 = vmatpush3.bf16.msra.mxu0 %v391_v1  ;;  %387 = vmatmul.mubr.msk.bf16.vlgmr.msra.gmra.mxu1 %vm203_vm0, %v399_v6  ;;  %v330_v15 = vld [vmem:[%s509_s6] ss:$0 sm:$0xff] }
   0x8   :  { %368 = vmatprep.subr.bf16.mxu0 %v392_v2  ;;  %v323_v17 = vld [vmem:[%s510_s2] ss:$0 sm:$0xff] }
   0x9   :  { %v331_v19 = vld [vmem:[%s511_s7] ss:$0 sm:$0xff] }
   0xa   :  { %v324_v21 = vld [vmem:[%s512_s3] ss:$0 sm:$0xff] }
   0xb   :  { %369 = vmatpush3.bf16.msra.mxu0 %v392_v2 }
   0xc   :  { %370 = vmatprep.subr.bf16.mxu0 %v393_v4 }
   0xf   :  { %371 = vmatpush3.bf16.msra.mxu0 %v393_v4 }
  0x10   :  { %372 = vmatprep.subr.bf16.mxu0 %v394_v8 }
  0x13   :  { %373 = vmatpush3.bf16.msra.mxu0 %v394_v8 }
  0x14   :  { %374 = vmatprep.subr.bf16.mxu0 %v395_v9 }
  0x17   :  { %375 = vmatpush3.bf16.msra.mxu0 %v395_v9 }
  0x18   :  { %376 = vmatprep.subr.bf16.mxu0 %v397_v10 }
  0x1b   :  { %377 = vmatpush3.bf16.msra.mxu0 %v397_v10 }
  0x1c   :  { %378 = vmatprep.subr.bf16.mxu0 %v400_v11 }
  0x1f   :  { %379 = vmatpush3.bf16.msra.mxu0 %v400_v11 }
  0x22   :  { %381 = vmatmul.mubr.bf16.vlgmr.msra.gmra.mxu0 %v402_v12 }
  0xc7   :  { %v388_v13 = vpop.f32.mrf.mxu1 }
  0xc8   :  { %v268_v18 = vmul.f32 %v388_v13, %v330_v15 }
  0xc9   :  { %v244_v14 = vpop.f32.mrf.mxu1 }
  0xca   :  { %v266_v23 = vmul.f32 %v330_v15, %v244_v14  ;;  %v279_v26 = vadd.f32 %v331_v19, %v268_v18 }
  0xcb   :  { %v389_v16 = vpop.f32.mrf.mxu1 }
  0xcc   :  { %v269_v27 = vmul.f32 %v389_v16, %v330_v15  ;;  %v277_v34 = vadd.f32 %v331_v19, %v266_v23 }
  0xcd   :  { %v247_v24 = vpop.f32.mrf.mxu1 }
  0xce   :  { %v267_v31 = vmul.f32 %v330_v15, %v247_v24  ;;  %v280_v36 = vadd.f32 %v331_v19, %v269_v27 }
  0xd0   :  { %v278_v40 = vadd.f32 %v331_v19, %v267_v31 }
  0xe2   :  { %v382_v20 = vpop.f32.mrf.mxu0 }
  0xe3   :  { %v168_v22 = vmul.f32 %v382_v20, %v323_v17 }
  0xe4   :  { %v144_v25 = vpop.f32.mrf.mxu0 }
  0xe5   :  { %v179_v28 = vadd.f32 %v324_v21, %v168_v22  ;;  %v166_v29 = vmul.f32 %v323_v17, %v144_v25 }
  0xe6   :  { %v383_v30 = vpop.f32.mrf.mxu0 }
  0xe7   :  { %v177_v32 = vadd.f32 %v324_v21, %v166_v29  ;;  %v169_v33 = vmul.f32 %v383_v30, %v323_v17  ;;  %v283_v37 = vadd.f32 %v279_v26, %v179_v28 }
  0xe8   :  { %v147_v35 = vpop.f32.mrf.mxu0 }
  0xe9   :  { %v180_v38 = vadd.f32 %v324_v21, %v169_v33  ;;  %v167_v39 = vmul.f32 %v323_v17, %v147_v35  ;;  %v281_v41 = vadd.f32 %v277_v34, %v177_v32  ;;  %v287_v44 = vmax.f32 %v283_v37, 0.0 }
  0xeb   :  { %v284_v42 = vadd.f32 %v280_v36, %v180_v38  ;;  %v178_v43 = vadd.f32 %v324_v21, %v167_v39  ;;  %v285_v47 = vmax.f32 %v281_v41, 0.0 }
  0xed   :  { %v288_v45 = vmax.f32 %v284_v42, 0.0  ;;  %v282_v46 = vadd.f32 %v278_v40, %v178_v43 }
  0xef   :  { %v348_v48 = vpack.c.bf16 %v288_v45, %v287_v44  ;;  %v286_v49 = vmax.f32 %v282_v46, 0.0 }
  0xf1   :  { %350 = vst [vmem:[%s513_s8 + $0x8] sm:$0xff] %v348_v48   ;;  %v343_v50 = vpack.c.bf16 %v286_v49, %v285_v47 }
  0xf3   :  { %344 = vst [vmem:[%s513_s8] sm:$0xff] %v343_v50  }

// kernel: bottleneck_forward.4
= control target key start
LH: loop header
LB: loop body
LE: loop exit
PB: predicated region body
PF: predicated region fallthrough
CT: control target
= control target key end

     0   :  { %s2212_s15 = smov 0   ;;  %s2501_s0 = inlined_call_operand.vmem [shape: bf16[2,4,48,128], index: 0, kind: input, shape index: {}]   ;;  %s2502_s1 = inlined_call_operand.vmem [shape: bf16[9,128,128], index: 1, kind: input, shape index: {}]   ;;  %s2503_s2 = inlined_call_operand.vmem [shape: f32[1,128], index: 2, kind: input, shape index: {}]   ;;  %s2504_s3 = inlined_call_operand.vmem [shape: f32[1,128], index: 3, kind: input, shape index: {}]   ;;  %s2505_s4 = inlined_call_operand.vmem [shape: bf16[2,4,4,128], index: 4, kind: output, shape index: {}]  }
   0x1 LB: > { %s1552_s16 = sadd.s32 4294967295, %s2185_s15   ;;  %p1556_p0 = scmp.ge.s32.totalorder %s2185_s15, 1  ;;  %s2185_s15 = sphi %s2212_s15, %s14_s15  }
   0x2   : > { %p162_p1 = scmp.lt.s32.totalorder %s2185_s15, 3 }
   0x4   : > { %p163_p2 = pnand %p1556_p0, %p162_p1 }
   0x5   : > { %p188_p3 = scmp.lt.s32.totalorder (!%p163_p2), %s1552_s16, 1 }
   0x6   : > { %166 = sbr.rel (%p163_p2) target bundleno = 382 (0x17e), region = 36 }
   0xb   : > { %v2086_v0 = vld [vmem:[%s2502_s1 + $0x78] sm:$0xff]   ;;  %v2088_v2 = vld [vmem:[%s2502_s1 + $0x70] sm:$0xff]   ;;  %v2090_v4 = vld [vmem:[%s2502_s1 + $0x68] sm:$0xff]   ;;  %s2507_s16 = smov (!%p188_p3, %s1552_s16), 1  ;;  %vm494_vm0 = vsmask.f32 7424 }
   0xc   : > { %v2087_v1 = vld [vmem:[%s2502_s1 + $0x38] sm:$0xff]   ;;  %1897 = vmatprep.subr.bf16.mxu0 %v2086_v0  ;;  %v2089_v3 = vld [vmem:[%s2502_s1 + $0x30] sm:$0xff]   ;;  %v2091_v5 = vld [vmem:[%s2502_s1 + $0x28] sm:$0xff]   ;;  %s2077_s7 = smul.u32 96, %s2507_s16  ;;  %s1806_s29 = sshll.u32 %s2507_s16, 3 }
   0xd   : > { %1917 = vmatprep.subr.bf16.mxu1 %v2087_v1  ;;  %1898 = vmatpush3.bf16.msra.mxu0 %v2086_v0  ;;  %v2092_v6 = vld [vmem:[%s2502_s1 + $0x60] sm:$0xff]   ;;  %v2094_v8 = vld [vmem:[%s2502_s1 + $0x58] sm:$0xff]   ;;  %v2096_v10 = vld [vmem:[%s2502_s1 + $0x50] sm:$0xff]   ;;  %s197_s6 = scalar_lea.vmem %s2505_s4, %s1806_s29 }
   0xe   : > { %1918 = vmatpush3.bf16.msra.mxu1 %v2087_v1  ;;  %1899 = vmatprep.subr.bf16.mxu0 %v2088_v2  ;;  %v2093_v7 = vld [vmem:[%s2502_s1 + $0x20] sm:$0xff]   ;;  %v2095_v9 = vld [vmem:[%s2502_s1 + $0x18] sm:$0xff]   ;;  %s2256_s14 = scalar_lea.vmem %s2501_s0, %s2077_s7  ;;  %v2097_v11 = vld [vmem:[%s2502_s1 + $0x10] sm:$0xff]  }
   0xf   : > { %1919 = vmatprep.subr.bf16.mxu1 %v2089_v3  ;;  %v2102_v12 = vld [vmem:[%s2256_s14 + $0x18] sm:$0xff]   ;;  %v2103_v13 = vld [vmem:[%s2256_s14] sm:$0xff]   ;;  %v2098_v14 = vld [vmem:[%s2502_s1 + $0x48] sm:$0xff]  }
  0x10   : > { %1913 = vmatprep.mubr.bf16.mxu0 %v2102_v12  ;;  %1933 = vmatprep.mubr.bf16.mxu1 %v2103_v13  ;;  %v2099_v15 = vld [vmem:[%s2502_s1 + $0x8] sm:$0xff]   ;;  %v2100_v16 = vld [vmem:[%s2502_s1 + $0x40] sm:$0xff]   ;;  %v2106_v18 = vld [vmem:[%s2502_s1 + $0xb8] sm:$0xff]  }
  0x11   : > { %1900 = vmatpush3.bf16.msra.mxu0 %v2088_v2  ;;  %v2101_v17 = vld [vmem:[%s2502_s1] sm:$0xff]   ;;  %v2107_v19 = vld [vmem:[%s2502_s1 + $0xf8] sm:$0xff]   ;;  %v2105_v21 = vld [vmem:[%s2256_s14 + $0x8] sm:$0xff]  }
  0x12   : > { %1920 = vmatpush3.bf16.msra.mxu1 %v2089_v3  ;;  %1901 = vmatprep.subr.bf16.mxu0 %v2090_v4  ;;  %v2104_v20 = vld [vmem:[%s2256_s14 + $0x20] sm:$0xff]   ;;  %v2108_v22 = vld [vmem:[%s2502_s1 + $0xb0] sm:$0xff]   ;;  %v2110_v24 = vld [vmem:[%s2502_s1 + $0xa8] sm:$0xff]  }
  0x13   : > { %1921 = vmatprep.subr.bf16.mxu1 %v2091_v5  ;;  %v2109_v23 = vld [vmem:[%s2502_s1 + $0xf0] sm:$0xff]   ;;  %v459_v25 = vld [vmem:[%s2256_s14] sm:$0xf]  ;;  %v2297_v26 = vld [vmem:[%s2256_s14 + $0x4] sm:$0xf] }
  0x14   : > { %v2300_v27 = vld [vmem:[%s2256_s14 + $0x8] sm:$0xf]  ;;  %v2306_v29 = vld [vmem:[%s2256_s14 + $0xc] sm:$0xf]  ;;  %v1616_v30 = vcombine.low %v459_v25, %v2297_v26  ;;  %v2112_v31 = vld [vmem:[%s2502_s1 + $0xa0] sm:$0xff]  }
  0x15   : > { %1902 = vmatpush3.bf16.msra.mxu0 %v2090_v4  ;;  %v2111_v28 = vld [vmem:[%s2502_s1 + $0xe8] sm:$0xff]   ;;  %v1617_v32 = vcombine.low %v2300_v27, %v2306_v29  ;;  %v2126_v36 = vld [vmem:[%s2256_s14 + $0x30] sm:$0xff]   ;;  %v2113_v37 = vld [vmem:[%s2502_s1 + $0xe0] sm:$0xff]  }
  0x16   : > { %1922 = vmatpush3.bf16.msra.mxu1 %v2091_v5  ;;  %1903 = vmatprep.subr.bf16.mxu0 %v2092_v6  ;;  %v496_v33 = vshrl.u32 %v1616_v30, 16  ;;  %v498_v34 = vshll.u32 %v1616_v30, 16  ;;  %v2114_v41 = vld [vmem:[%s2502_s1 + $0x98] sm:$0xff]   ;;  %v2116_v44 = vld [vmem:[%s2502_s1 + $0x90] sm:$0xff]   ;;  %v2118_v47 = vld [vmem:[%s2502_s1 + $0x88] sm:$0xff]  }
  0x17   : > { %1923 = vmatprep.subr.bf16.mxu1 %v2093_v7  ;;  %v503_v35 = vshll.u32 %v1617_v32, 16  ;;  %v2115_v42 = vld [vmem:[%s2502_s1 + $0xd8] sm:$0xff]   ;;  %v2117_v45 = vld [vmem:[%s2502_s1 + $0xd0] sm:$0xff]   ;;  %v2119_v48 = vld [vmem:[%s2502_s1 + $0xc8] sm:$0xff]   ;;  %v507_v49 = vshrl.u32 %v1617_v32, 16 }
  0x18   : > { %v500_v38 = vrot.slane %v498_v34, 1  ;;  %v2124_v46 = vld [vmem:[%s2256_s14 + $0x10] ss:$0 sps:$4 sm:$0x11]   ;;  %v2120_v51 = vld [vmem:[%s2502_s1 + $0x80] sm:$0xff]   ;;  %v2125_v55 = vld [vmem:[%s2502_s1 + $0x138] sm:$0xff]  }
  0x19   : > { %1904 = vmatpush3.bf16.msra.mxu0 %v2092_v6  ;;  %v505_v39 = vrot.slane %v503_v35, 1  ;;  %v511_v50 = vshll.u32 %v2124_v46, 16  ;;  %v2121_v52 = vld [vmem:[%s2502_s1 + $0xc0] sm:$0xff]   ;;  %v2128_v56 = vld [vmem:[%s2502_s1 + $0x178] sm:$0xff]   ;;  %v2146_v57 = vld [vmem:[%s2256_s14 + $0x30] sm:$0xff]  }
  0x1a   : > { %1924 = vmatpush3.bf16.msra.mxu1 %v2093_v7  ;;  %1905 = vmatprep.subr.bf16.mxu0 %v2094_v8  ;;  %v501_v40 = vor.u32 %v500_v38, %v496_v33  ;;  %v2127_v58 = vld [vmem:[%s2256_s14 + $0x38] sm:$0xff]   ;;  %v924_v61 = vshrl.u32 %v2146_v57, 16  ;;  %v926_v62 = vshll.u32 %v2146_v57, 16  ;;  %v2129_v63 = vld [vmem:[%s2502_s1 + $0x130] sm:$0xff]   ;;  %v2143_v2 = vld [vmem:[%s2256_s14 + $0x48] sm:$0xff]   ;;  %v1735_v33 = vcombine.low %v2297_v26, %v2300_v27 }
  0x1b   : > { %1925 = vmatprep.subr.bf16.mxu1 %v2095_v9  ;;  %v509_v53 = vor.u32 %v507_v49, %v505_v39  ;;  %v513_v54 = vrot.slane %v511_v50, 1  ;;  %v2353_v59 = vld [vmem:[%s2256_s14 + $0x38] sm:$0xff]   ;;  %v2130_v0 = vld [vmem:[%s2502_s1 + $0x170] sm:$0xff]   ;;  %v2131_v6 = vld [vmem:[%s2502_s1 + $0x128] sm:$0xff]  }
  0x1c   : > { %v506_v43 = vsel %vm494_vm0, %v501_v40, %v505_v39  ;;  %v931_v1 = vshll.u32 %v2353_v59, 16  ;;  %v928_v3 = vrot.slane %v926_v62, 1  ;;  %v2132_v7 = vld [vmem:[%s2502_s1 + $0x168] sm:$0xff]   ;;  %v2136_v12 = vld [vmem:[%s2502_s1 + $0x158] sm:$0xff]   ;;  %v2137_v13 = vld [vmem:[%s2502_s1 + $0x110] sm:$0xff]  }
  0x1d   : > { %1906 = vmatpush3.bf16.msra.mxu0 %v2094_v8  ;;  %v514_v60 = vsel %vm494_vm0, %v509_v53, %v513_v54  ;;  %v2149_v25 = vld [vmem:[%s2502_s1 + $0x1f8] sm:$0xff]   ;;  %v2151_v32 = vld [vmem:[%s2502_s1 + $0x1f0] sm:$0xff]   ;;  %v2152_v35 = vld [vmem:[%s2502_s1 + $0x1a8] sm:$0xff]  }
  0x1e   : > { %1926 = vmatpush3.bf16.msra.mxu1 %v2095_v9  ;;  %1907 = vmatprep.subr.bf16.mxu0 %v2096_v10  ;;  %v933_v4 = vrot.slane %v931_v1, 1  ;;  %v929_v5 = vor.u32 %v928_v3, %v924_v61  ;;  %v2133_v9 = vld [vmem:[%s2502_s1 + $0x120] sm:$0xff]   ;;  %v2157_v38 = vld [vmem:[%s2502_s1 + $0x1d8] sm:$0xff]   ;;  %v2158_v39 = vld [vmem:[%s2502_s1 + $0x190] sm:$0xff]  }
  0x1f   : > { %1927 = vmatprep.subr.bf16.mxu1 %v2097_v11  ;;  %v2167_v34 = vld [vmem:[%s2256_s14 + $0x1c] sm:$0xff]   ;;  %v2159_v40 = vld [vmem:[%s2502_s1 + $0x1d0] sm:$0xff]  }
  0x20   : > { %v934_v8 = vsel %vm494_vm0, %v929_v5, %v933_v4  ;;  %v2154_v26 = vld [vmem:[%s2502_s1 + $0x1a0] sm:$0xff]   ;;  %v2169_v57 = vld [vmem:[%s2502_s1 + $0x230] sm:$0xff]  }
  0x21   : > { %1908 = vmatpush3.bf16.msra.mxu0 %v2096_v10  ;;  %v2134_v10 = vld [vmem:[%s2502_s1 + $0x160] sm:$0xff]   ;;  %v2173_v61 = vld [vmem:[%s2502_s1 + $0x210] sm:$0xff]  }
  0x22   : > { %1928 = vmatpush3.bf16.msra.mxu1 %v2097_v11  ;;  %1909 = vmatprep.subr.bf16.mxu0 %v2098_v14  ;;  %v2135_v11 = vld [vmem:[%s2502_s1 + $0x118] sm:$0xff]   ;;  %v2155_v27 = vld [vmem:[%s2502_s1 + $0x1e0] sm:$0xff]   ;;  %v2178_v62 = vld [vmem:[%s2256_s14 + $0x14] ss:$0 sps:$4 sm:$0x11]  }
  0x23   : > { %1929 = vmatprep.subr.bf16.mxu1 %v2099_v15  ;;  %v2162_v46 = vld [vmem:[%s2502_s1 + $0x180] sm:$0xff]   ;;  %v1356_v1 = vshll.u32 %v2178_v62, 16 }
  0x24   : > { %v1802_v62 = vld [vmem:[%s2503_s2] ss:$0 sm:$0xff] }
  0x25   : > { %1910 = vmatpush3.bf16.msra.mxu0 %v2098_v14  ;;  %v2138_v14 = vld [vmem:[%s2502_s1 + $0x150] sm:$0xff]  }
  0x26   : > { %1930 = vmatpush3.bf16.msra.mxu1 %v2099_v15  ;;  %1911 = vmatprep.subr.bf16.mxu0 %v2100_v16  ;;  %v2148_v15 = vld [vmem:[%s2256_s14 + $0x40] ss:$0 sps:$4 sm:$0x11]  }
  0x27   : > { %1931 = vmatprep.subr.bf16.mxu1 %v2101_v17 }
  0x29   : > { %1912 = vmatpush3.bf16.msra.mxu0 %v2100_v16  ;;  %v2139_v16 = vld [vmem:[%s2502_s1 + $0x108] sm:$0xff]  }
  0x2a   : > { %1932 = vmatpush3.bf16.msra.mxu1 %v2101_v17  ;;  %1937 = vmatprep.subr.bf16.mxu0 %v2106_v18  ;;  %v2140_v17 = vld [vmem:[%s2502_s1 + $0x148] sm:$0xff]  }
  0x2b   : > { %1957 = vmatprep.subr.bf16.mxu1 %v2107_v19 }
  0x2c   : > { %1914 = vmatmul.mubr.bf16.vlgmr.msra.gmra.mxu0 %v2104_v20  ;;  %v935_v20 = vshrl.u32 %v2353_v59, 16  ;;  %v2170_v59 = vld [vmem:[%s2502_s1 + $0x228] sm:$0xff]  }
  0x2d   : > { %1934 = vmatmul.mubr.bf16.vlgmr.msra.gmra.mxu1 %v2105_v21  ;;  %1938 = vmatpush3.bf16.msra.mxu0 %v2106_v18  ;;  %v2141_v18 = vld [vmem:[%s2502_s1 + $0x100] sm:$0xff]   ;;  %v939_v21 = vshll.u32 %v2148_v15, 16 }
  0x2e   : > { %1958 = vmatpush3.bf16.msra.mxu1 %v2107_v19  ;;  %1939 = vmatprep.subr.bf16.mxu0 %v2108_v22  ;;  %v2142_v19 = vld [vmem:[%s2502_s1 + $0x140] sm:$0xff]  }
  0x2f   : > { %1959 = vmatprep.subr.bf16.mxu1 %v2109_v23  ;;  %1973 = vmatprep.mubr.bf16.mxu1 %v2126_v36  ;;  %v2153_v36 = vld [vmem:[%s2502_s1 + $0x1e8] sm:$0xff]  }
  0x30   : > { %1953 = vmatprep.mubr.bf16.mxu0 %v506_v43  ;;  %v2161_v43 = vld [vmem:[%s2502_s1 + $0x1c8] sm:$0xff]  }
  0x31   : > { %1940 = vmatpush3.bf16.msra.mxu0 %v2108_v22  ;;  %v2145_v22 = vld [vmem:[%s2502_s1 + $0x1b8] sm:$0xff]  }
  0x32   : > { %1960 = vmatpush3.bf16.msra.mxu1 %v2109_v23  ;;  %1941 = vmatprep.subr.bf16.mxu0 %v2110_v24  ;;  %v937_v23 = vor.u32 %v935_v20, %v933_v4  ;;  %v1358_v4 = vrot.slane %v1356_v1, 1 }
  0x33   : > { %1961 = vmatprep.subr.bf16.mxu1 %v2111_v28 }
  0x35   : > { %1942 = vmatpush3.bf16.msra.mxu0 %v2110_v24  ;;  %v941_v24 = vrot.slane %v939_v21, 1 }
  0x36   : > { %1962 = vmatpush3.bf16.msra.mxu1 %v2111_v28  ;;  %1943 = vmatprep.subr.bf16.mxu0 %v2112_v31  ;;  %v2144_v28 = vld [vmem:[%s2256_s14 + $0x50] sm:$0xff]  }
  0x37   : > { %1963 = vmatprep.subr.bf16.mxu1 %v2113_v37  ;;  %v942_v30 = vsel %vm494_vm0, %v937_v23, %v941_v24 }
  0x39   : > { %1944 = vmatpush3.bf16.msra.mxu0 %v2112_v31  ;;  %v2150_v31 = vld [vmem:[%s2502_s1 + $0x1b0] sm:$0xff]  }
  0x3a   : > { %1964 = vmatpush3.bf16.msra.mxu1 %v2113_v37  ;;  %1945 = vmatprep.subr.bf16.mxu0 %v2114_v41  ;;  %v2156_v37 = vld [vmem:[%s2502_s1 + $0x198] sm:$0xff]  }
  0x3b   : > { %1965 = vmatprep.subr.bf16.mxu1 %v2115_v42 }
  0x3d   : > { %1946 = vmatpush3.bf16.msra.mxu0 %v2114_v41  ;;  %v2176_v41 = vld [vmem:[%s2256_s14 + $0x4] sm:$0xff]  }
  0x3e   : > { %1966 = vmatpush3.bf16.msra.mxu1 %v2115_v42  ;;  %1947 = vmatprep.subr.bf16.mxu0 %v2116_v44  ;;  %v2160_v42 = vld [vmem:[%s2502_s1 + $0x188] sm:$0xff]  }
  0x3f   : > { %1967 = vmatprep.subr.bf16.mxu1 %v2117_v45 }
  0x41   : > { %1948 = vmatpush3.bf16.msra.mxu0 %v2116_v44  ;;  %v2177_v44 = vld [vmem:[%s2256_s14 + $0xc] sm:$0xff]  }
  0x42   : > { %1968 = vmatpush3.bf16.msra.mxu1 %v2117_v45  ;;  %1949 = vmatprep.subr.bf16.mxu0 %v2118_v47  ;;  %v1343_v45 = vshll.u32 %v2176_v41, 16  ;;  %v1348_v50 = vshll.u32 %v2177_v44, 16 }
  0x43   : > { %1969 = vmatprep.subr.bf16.mxu1 %v2119_v48 }
  0x44   : > { %v1345_v49 = vrot.slane %v1343_v45, 1  ;;  %v1350_v54 = vrot.slane %v1348_v50, 1 }
  0x45   : > { %1950 = vmatpush3.bf16.msra.mxu0 %v2118_v47  ;;  %v2163_v47 = vld [vmem:[%s2502_s1 + $0x1c0] sm:$0xff]  }
  0x46   : > { %1970 = vmatpush3.bf16.msra.mxu1 %v2119_v48  ;;  %1951 = vmatprep.subr.bf16.mxu0 %v2120_v51  ;;  %v1341_v48 = vshrl.u32 %v2176_v41, 16 }
  0x47   : > { %1971 = vmatprep.subr.bf16.mxu1 %v2121_v52 }
  0x48   : > { %v1346_v53 = vor.u32 %v1345_v49, %v1341_v48 }
  0x49   : > { %1952 = vmatpush3.bf16.msra.mxu0 %v2120_v51  ;;  %v1046_v51 = vld [vmem:[%s2256_s14 + $0x10] sm:$0xf] }
  0x4a   : > { %1972 = vmatpush3.bf16.msra.mxu1 %v2121_v52  ;;  %1977 = vmatprep.subr.bf16.mxu0 %v2125_v55  ;;  %v2166_v52 = vld [vmem:[%s2502_s1 + $0x238] sm:$0xff]  }
  0x4b   : > { %1997 = vmatprep.subr.bf16.mxu1 %v2128_v56 }
  0x4c   : > { %1954 = vmatmul.mubr.bf16.vlgmr.msra.gmra.mxu0 %v514_v60  ;;  %v2172_v60 = vld [vmem:[%s2502_s1 + $0x218] sm:$0xff]  }
  0x4d   : > { %1978 = vmatpush3.bf16.msra.mxu0 %v2125_v55  ;;  %1974 = vmatmul.mubr.bf16.vlgmr.msra.gmra.mxu1 %v2127_v58  ;;  %v1736_v55 = vcombine.low %v2306_v29, %v1046_v51  ;;  %v1351_v58 = vsel %vm494_vm0, %v1346_v53, %v1350_v54  ;;  %v2171_v29 = vld [vmem:[%s2502_s1 + $0x220] sm:$0xff]  }
  0x4e   : > { %1998 = vmatpush3.bf16.msra.mxu1 %v2128_v56  ;;  %1979 = vmatprep.subr.bf16.mxu0 %v2129_v63  ;;  %v2168_v56 = vld [vmem:[%s2256_s14 + $0x24] sm:$0xff]  }
  0x4f   : > { %1999 = vmatprep.subr.bf16.mxu1 %v2130_v0  ;;  %1993 = vmatprep.mubr.bf16.mxu0 %v2143_v2  ;;  %v2175_v2 = vld [vmem:[%s2502_s1 + $0x200] sm:$0xff]  }
  0x50   : > { %2013 = vmatprep.mubr.bf16.mxu1 %v934_v8 }
  0x51   : > { %1980 = vmatpush3.bf16.msra.mxu0 %v2129_v63  ;;  %v2174_v63 = vld [vmem:[%s2502_s1 + $0x208] sm:$0xff]  }
  0x52   : > { %2000 = vmatpush3.bf16.msra.mxu1 %v2130_v0  ;;  %1981 = vmatprep.subr.bf16.mxu0 %v2131_v6  ;;  %v1352_v0 = vshrl.u32 %v2177_v44, 16 }
  0x53   : > { %2001 = vmatprep.subr.bf16.mxu1 %v2132_v7 }
  0x54   : > { %v1354_v3 = vor.u32 %v1352_v0, %v1350_v54 }
  0x55   : > { %1982 = vmatpush3.bf16.msra.mxu0 %v2131_v6 }
  0x56   : > { %2002 = vmatpush3.bf16.msra.mxu1 %v2132_v7  ;;  %1983 = vmatprep.subr.bf16.mxu0 %v2133_v9  ;;  %v1359_v5 = vsel %vm494_vm0, %v1354_v3, %v1358_v4  ;;  %v1803_v3 = vld [vmem:[%s2504_s3] ss:$0 sm:$0xff] }
  0x57   : > { %2003 = vmatprep.subr.bf16.mxu1 %v2134_v10 }
  0x59   : > { %1984 = vmatpush3.bf16.msra.mxu0 %v2133_v9 }
  0x5a   : > { %2004 = vmatpush3.bf16.msra.mxu1 %v2134_v10  ;;  %1985 = vmatprep.subr.bf16.mxu0 %v2135_v11 }
  0x5b   : > { %2005 = vmatprep.subr.bf16.mxu1 %v2136_v12 }
  0x5d   : > { %1986 = vmatpush3.bf16.msra.mxu0 %v2135_v11 }
  0x5e   : > { %2006 = vmatpush3.bf16.msra.mxu1 %v2136_v12  ;;  %1987 = vmatprep.subr.bf16.mxu0 %v2137_v13 }
  0x5f   : > { %2007 = vmatprep.subr.bf16.mxu1 %v2138_v14 }
  0x61   : > { %1988 = vmatpush3.bf16.msra.mxu0 %v2137_v13 }
  0x62   : > { %2008 = vmatpush3.bf16.msra.mxu1 %v2138_v14  ;;  %1989 = vmatprep.subr.bf16.mxu0 %v2139_v16 }
  0x63   : > { %2009 = vmatprep.subr.bf16.mxu1 %v2140_v17 }
  0x65   : > { %1990 = vmatpush3.bf16.msra.mxu0 %v2139_v16 }
  0x66   : > { %2010 = vmatpush3.bf16.msra.mxu1 %v2140_v17  ;;  %1991 = vmatprep.subr.bf16.mxu0 %v2141_v18 }
  0x67   : > { %2011 = vmatprep.subr.bf16.mxu1 %v2142_v19 }
  0x69   : > { %1992 = vmatpush3.bf16.msra.mxu0 %v2141_v18 }
  0x6a   : > { %2012 = vmatpush3.bf16.msra.mxu1 %v2142_v19  ;;  %2017 = vmatprep.subr.bf16.mxu0 %v2145_v22 }
  0x6b   : > { %2037 = vmatprep.subr.bf16.mxu1 %v2149_v25 }
  0x6c   : > { %1994 = vmatmul.mubr.bf16.vlgmr.msra.gmra.mxu0 %v2144_v28 }
  0x6d   : > { %2018 = vmatpush3.bf16.msra.mxu0 %v2145_v22  ;;  %2014 = vmatmul.mubr.bf16.vlgmr.msra.gmra.mxu1 %v942_v30 }
  0x6e   : > { %2038 = vmatpush3.bf16.msra.mxu1 %v2149_v25  ;;  %2019 = vmatprep.subr.bf16.mxu0 %v2150_v31 }
  0x6f   : > { %2039 = vmatprep.subr.bf16.mxu1 %v2151_v32  ;;  %2033 = vmatprep.mubr.bf16.mxu0 %v1735_v33 }
  0x70   : > { %2053 = vmatprep.mubr.bf16.mxu1 %v2167_v34 }
  0x71   : > { %2020 = vmatpush3.bf16.msra.mxu0 %v2150_v31 }
  0x72   : > { %2040 = vmatpush3.bf16.msra.mxu1 %v2151_v32  ;;  %2021 = vmatprep.subr.bf16.mxu0 %v2152_v35 }
  0x73   : > { %2041 = vmatprep.subr.bf16.mxu1 %v2153_v36 }
  0x75   : > { %2022 = vmatpush3.bf16.msra.mxu0 %v2152_v35 }
  0x76   : > { %2042 = vmatpush3.bf16.msra.mxu1 %v2153_v36  ;;  %2023 = vmatprep.subr.bf16.mxu0 %v2154_v26 }
  0x77   : > { %2043 = vmatprep.subr.bf16.mxu1 %v2155_v27 }
  0x79   : > { %2024 = vmatpush3.bf16.msra.mxu0 %v2154_v26 }
  0x7a   : > { %2044 = vmatpush3.bf16.msra.mxu1 %v2155_v27  ;;  %2025 = vmatprep.subr.bf16.mxu0 %v2156_v37 }
  0x7b   : > { %2045 = vmatprep.subr.bf16.mxu1 %v2157_v38 }
  0x7d   : > { %2026 = vmatpush3.bf16.msra.mxu0 %v2156_v37 }
  0x7e   : > { %2046 = vmatpush3.bf16.msra.mxu1 %v2157_v38  ;;  %2027 = vmatprep.subr.bf16.mxu0 %v2158_v39 }
  0x7f   : > { %2047 = vmatprep.subr.bf16.mxu1 %v2159_v40 }
  0x81   : > { %2028 = vmatpush3.bf16.msra.mxu0 %v2158_v39 }
  0x82   : > { %2048 = vmatpush3.bf16.msra.mxu1 %v2159_v40  ;;  %2029 = vmatprep.subr.bf16.mxu0 %v2160_v42 }
  0x83   : > { %2049 = vmatprep.subr.bf16.mxu1 %v2161_v43 }
  0x85   : > { %2030 = vmatpush3.bf16.msra.mxu0 %v2160_v42 }
  0x86   : > { %2050 = vmatpush3.bf16.msra.mxu1 %v2161_v43  ;;  %2031 = vmatprep.subr.bf16.mxu0 %v2162_v46 }
  0x87   : > { %2051 = vmatprep.subr.bf16.mxu1 %v2163_v47 }
  0x89   : > { %2032 = vmatpush3.bf16.msra.mxu0 %v2162_v46 }
  0x8a   : > { %2052 = vmatpush3.bf16.msra.mxu1 %v2163_v47  ;;  %2057 = vmatprep.subr.bf16.mxu0 %v2166_v52 }
  0x8c   : > { %2034 = vmatmul.mubr.bf16.vlgmr.msra.gmra.mxu0 %v1736_v55 }
  0x8d   : > { %2058 = vmatpush3.bf16.msra.mxu0 %v2166_v52  ;;  %2054 = vmatmul.mubr.bf16.vlgmr.msra.gmra.mxu1 %v2168_v56 }
  0x8e   : > { %2059 = vmatprep.subr.bf16.mxu0 %v2169_v57  ;;  %2073 = vmatprep.mubr.bf16.mxu0 %v1351_v58 }
  0x91   : > { %2060 = vmatpush3.bf16.msra.mxu0 %v2169_v57 }
  0x92   : > { %2061 = vmatprep.subr.bf16.mxu0 %v2170_v59 }
  0x95   : > { %2062 = vmatpush3.bf16.msra.mxu0 %v2170_v59 }
  0x96   : > { %2063 = vmatprep.subr.bf16.mxu0 %v2171_v29 }
  0x99   : > { %2064 = vmatpush3.bf16.msra.mxu0 %v2171_v29 }
  0x9a   : > { %2065 = vmatprep.subr.bf16.mxu0 %v2172_v60 }
  0x9d   : > { %2066 = vmatpush3.bf16.msra.mxu0 %v2172_v60 }
  0x9e   : > { %2067 = vmatprep.subr.bf16.mxu0 %v2173_v61 }
  0xa1   : > { %2068 = vmatpush3.bf16.msra.mxu0 %v2173_v61 }
  0xa2   : > { %2069 = vmatprep.subr.bf16.mxu0 %v2174_v63 }
  0xa5   : > { %2070 = vmatpush3.bf16.msra.mxu0 %v2174_v63 }
  0xa6   : > { %2071 = vmatprep.subr.bf16.mxu0 %v2175_v2 }
  0xa9   : > { %2072 = vmatpush3.bf16.msra.mxu0 %v2175_v2 }
  0xac   : > { %2074 = vmatmul.mubr.bf16.vlgmr.msra.gmra.mxu0 %v1359_v5 }
  0xec   : > { %v1915_v6 = vpop.f32.mrf.mxu0 }
  0xed   : > { %v1935_v7 = vpop.f32.mrf.mxu1 }
  0xee   : > { %v335_v8 = vpop.f32.mrf.mxu0  ;;  %v453_v30 = vadd.f32 %v1935_v7, %v1915_v6 }
  0xef   : > { %v444_v9 = vpop.f32.mrf.mxu1 }
  0xf0   : > { %v1916_v10 = vpop.f32.mrf.mxu0  ;;  %v445_v31 = vadd.f32 %v444_v9, %v335_v8 }
  0xf1   : > { %v1936_v11 = vpop.f32.mrf.mxu1 }
  0xf2   : > { %v338_v12 = vpop.f32.mrf.mxu0  ;;  %v456_v35 = vadd.f32 %v1936_v11, %v1916_v10 }
  0xf3   : > { %v447_v14 = vpop.f32.mrf.mxu1 }
  0xf4   : > { %v448_v27 = vadd.f32 %v447_v14, %v338_v12 }
 0x10c   : > { %v1955_v13 = vpop.f32.mrf.mxu0 }
 0x10d   : > { %v1975_v16 = vpop.f32.mrf.mxu1  ;;  %v616_v32 = vadd.f32 %v1955_v13, %v453_v30 }
 0x10e   : > { %v599_v15 = vpop.f32.mrf.mxu0 }
 0x10f   : > { %v734_v18 = vpop.f32.mrf.mxu1  ;;  %v614_v36 = vadd.f32 %v599_v15, %v445_v31  ;;  %v751_v37 = vadd.f32 %v1975_v16, %v616_v32 }
 0x110   : > { %v1956_v17 = vpop.f32.mrf.mxu0 }
 0x111   : > { %v1976_v20 = vpop.f32.mrf.mxu1  ;;  %v617_v38 = vadd.f32 %v1956_v17, %v456_v35  ;;  %v749_v40 = vadd.f32 %v734_v18, %v614_v36 }
 0x112   : > { %v602_v19 = vpop.f32.mrf.mxu0 }
 0x113   : > { %v737_v22 = vpop.f32.mrf.mxu1  ;;  %v615_v41 = vadd.f32 %v602_v19, %v448_v27  ;;  %v752_v45 = vadd.f32 %v1976_v20, %v617_v38 }
 0x115   : > { %v750_v47 = vadd.f32 %v737_v22, %v615_v41 }
 0x12c   : > { %v1995_v21 = vpop.f32.mrf.mxu0 }
 0x12d   : > { %v2015_v24 = vpop.f32.mrf.mxu1  ;;  %v886_v42 = vadd.f32 %v1995_v21, %v751_v37 }
 0x12e   : > { %v869_v23 = vpop.f32.mrf.mxu0 }
 0x12f   : > { %v1027_v28 = vpop.f32.mrf.mxu1  ;;  %v884_v46 = vadd.f32 %v869_v23, %v749_v40  ;;  %v1044_v48 = vadd.f32 %v2015_v24, %v886_v42 }
 0x130   : > { %v1996_v25 = vpop.f32.mrf.mxu0 }
 0x131   : > { %v2016_v34 = vpop.f32.mrf.mxu1  ;;  %v887_v49 = vadd.f32 %v1996_v25, %v752_v45  ;;  %v1042_v52 = vadd.f32 %v1027_v28, %v884_v46 }
 0x132   : > { %v872_v33 = vpop.f32.mrf.mxu0 }
 0x133   : > { %v1030_v39 = vpop.f32.mrf.mxu1  ;;  %v885_v53 = vadd.f32 %v872_v33, %v750_v47  ;;  %v1045_v55 = vadd.f32 %v2016_v34, %v887_v49 }
 0x135   : > { %v1043_v59 = vadd.f32 %v1030_v39, %v885_v53 }
 0x14c   : > { %v2035_v26 = vpop.f32.mrf.mxu0 }
 0x14d   : > { %v2055_v44 = vpop.f32.mrf.mxu1  ;;  %v1169_v54 = vadd.f32 %v2035_v26, %v1044_v48 }
 0x14e   : > { %v1152_v43 = vpop.f32.mrf.mxu0 }
 0x14f   : > { %v1286_v51 = vpop.f32.mrf.mxu1  ;;  %v1167_v56 = vadd.f32 %v1152_v43, %v1042_v52  ;;  %v1303_v29 = vadd.f32 %v2055_v44, %v1169_v54 }
 0x150   : > { %v2036_v50 = vpop.f32.mrf.mxu0 }
 0x151   : > { %v2056_v58 = vpop.f32.mrf.mxu1  ;;  %v1170_v60 = vadd.f32 %v2036_v50, %v1045_v55  ;;  %v1301_v63 = vadd.f32 %v1286_v51, %v1167_v56 }
 0x152   : > { %v1155_v57 = vpop.f32.mrf.mxu0 }
 0x153   : > { %v1168_v0 = vadd.f32 %v1155_v57, %v1043_v59  ;;  %v1289_v2 = vpop.f32.mrf.mxu1  ;;  %v1304_v5 = vadd.f32 %v2056_v58, %v1170_v60 }
 0x155   : > { %v1302_v9 = vadd.f32 %v1289_v2, %v1168_v0 }
 0x16c   : > { %v2075_v61 = vpop.f32.mrf.mxu0 }
 0x16d   : > { %v1461_v1 = vadd.f32 %v2075_v61, %v1303_v29 }
 0x16e   : > { %v1444_v4 = vpop.f32.mrf.mxu0 }
 0x16f   : > { %v1472_v6 = vmul.f32 %v1802_v62, %v1461_v1  ;;  %v1459_v7 = vadd.f32 %v1444_v4, %v1301_v63 }
 0x170   : > { %v2076_v8 = vpop.f32.mrf.mxu0 }
 0x171   : > { %v1483_v10 = vadd.f32 %v1803_v3, %v1472_v6  ;;  %v1470_v11 = vmul.f32 %v1802_v62, %v1459_v7  ;;  %v1462_v12 = vadd.f32 %v2076_v8, %v1304_v5 }
 0x172   : > { %v1447_v13 = vpop.f32.mrf.mxu0 }
 0x173   : > { %v1487_v14 = vmax.f32 %v1483_v10, 0.0  ;;  %v1481_v15 = vadd.f32 %v1803_v3, %v1470_v11  ;;  %v1473_v16 = vmul.f32 %v1802_v62, %v1462_v12  ;;  %v1460_v17 = vadd.f32 %v1447_v13, %v1302_v9 }
 0x175   : > { %v1491_v18 = vpack.c.bf16 %v1487_v14, %v1487_v14  ;;  %v1485_v19 = vmax.f32 %v1481_v15, 0.0  ;;  %v1484_v20 = vadd.f32 %v1803_v3, %v1473_v16  ;;  %v1471_v21 = vmul.f32 %v1802_v62, %v1460_v17 }
 0x177   : > { %1495 = vst [vmem:[%s197_s6 + $0x4] sm:$0x3] %v1491_v18  ;;  %v1489_v22 = vpack.c.bf16 %v1485_v19, %v1485_v19  ;;  %v1488_v23 = vmax.f32 %v1484_v20, 0.0  ;;  %v1482_v24 = vadd.f32 %v1803_v3, %v1471_v21 }
 0x179   : > { %1493 = vst [vmem:[%s197_s6] sm:$0x3] %v1489_v22  ;;  %v1492_v25 = vpack.c.bf16 %v1488_v23, %v1488_v23  ;;  %v1486_v28 = vmax.f32 %v1482_v24, 0.0 }
 0x17b   : > { %1496 = vst [vmem:[%s197_s6 + $0x6] sm:$0x3] %v1492_v25  ;;  %v1490_v30 = vpack.c.bf16 %v1486_v28, %v1486_v28 }
 0x17d   : > { %1494 = vst [vmem:[%s197_s6 + $0x2] sm:$0x3] %v1490_v30 }
 0x17e PF: > { %s14_s15 = sadd.s32 1, %s2185_s15  }
 0x17f   : > { %p11_p4 = scmp.ge.s32.totalorder %s14_s15, 4  }
 0x181   :  { %13 = sbr.rel (!%p11_p4) target bundleno = 1 (0x1), region = 77 }

</bundles_post_ra>
